<compile_context>
chip_gen: v7x
topology: tpu7x:2x2x1
jax: 0.10.0
libtpu: 0.0.40
codegen_flags: <defaults>
</compile_context>

<pallas_src>
import jax
import jax.numpy as jnp
from jax.experimental import pallas as pl
from jax.experimental.pallas import tpu as pltpu  # noqa: F401  (kept per template)

# ----------------------- small, module-consistent sizes ----------------------
IMAGE_SIZE = 16
PATCH_SIZE = 8
CHANNELS = 4
DIM = 32
HEADS = 4
HEAD_DIM = DIM // HEADS
MLP_DIM = 64                    # transformer feed-forward width
HEAD_HIDDEN = 4 * DIM           # mlp_head hidden width (nn.Linear(dim, dim*4))
NUM_CLASSES = 10
NUM_CLASSES_PAD = 128           # lane-dense output; sliced back in the wrapper
BATCH = 2

NUM_PATCHES = (IMAGE_SIZE // PATCH_SIZE) ** 2        # 4
PATCH_DIM = CHANNELS * PATCH_SIZE * PATCH_SIZE       # 256
SEQ = NUM_PATCHES + 1                                # 5  (cls token + patches)
SEQ_PAD = 8                                          # aligned 8-sublane batch block
ROWS = BATCH * SEQ_PAD

_EPS = 1e-5                     # PyTorch LayerNorm default eps
_INV_SQRT2 = 0.7071067811865476

# bf16 operands on a real TPU MXU; f32 elsewhere (the CPU DotThunk cannot
# execute bf16 x bf16 -> f32, which is what killed the previous version).
_MM_DTYPE = jnp.bfloat16 if jax.default_backend() == "tpu" else jnp.float32

# Packed layout of the small per-feature vectors (one DMA instead of eleven).
_VEC_W = 128
_VEC_NAMES = ("ln1_w", "ln1_b", "attn_bo", "ln2_w", "ln2_b", "ff_b1", "ff_b2",
              "head_ln_w", "head_ln_b", "head_b1", "head_b2")
_VROW = {n: i for i, n in enumerate(_VEC_NAMES)}


# ------------------------------- helpers -------------------------------------
def _full_spec(shape):
    """BlockSpec covering the whole array (block == array dims)."""
    zeros = (0,) * len(shape)
    return pl.BlockSpec(shape, lambda *_: zeros)


def _layer_norm(x, w, b):
    mu = jnp.mean(x, axis=-1, keepdims=True)
    var = jnp.mean(jnp.square(x - mu), axis=-1, keepdims=True)
    return (x - mu) * jax.lax.rsqrt(var + _EPS) * w + b


def _gelu(x):
    # exact GELU (PyTorch nn.GELU default): 0.5 * x * (1 + erf(x / sqrt(2)))
    return 0.5 * x * (1.0 + jax.lax.erf(x * _INV_SQRT2))


def _softmax(x):
    m = jnp.max(x, axis=-1, keepdims=True)
    e = jnp.exp(x - m)
    return e * pl.reciprocal(jnp.sum(e, axis=-1, keepdims=True), approx=True)


# ------------------------------- fused kernel --------------------------------
def vit_kernel(xf, base, bias, vecs, pe_w, wqkv, wo, w1, w2, hw1, hw2, o_ref):
    f32 = jnp.float32

    def vec(name, width):                      # (1, width) slice of the packed vectors
        r = _VROW[name]
        return vecs[r:r + 1, :width]

    # --- patch embedding: patches were pre-scattered to padded slab rows ------
    # xf: (B*SEQ_PAD, PATCH_DIM); cls / pad rows are zero so their embedding is 0.
    # base already holds cls_token+pos[0], pos[1:]+pe_b and zero pad rows.
    x = base[...] + jnp.dot(xf[...], pe_w[...], preferred_element_type=f32)

    # --- pre-norm multi-head self-attention (batch folded, fused QKV) ---------
    # TODO(synk): `transformer` is dependency-injected in the PyTorch module;
    # realized here as one pre-norm encoder layer (LN->MHSA->res, LN->MLP->res).
    h1 = _layer_norm(x, vec("ln1_w", DIM), vec("ln1_b", DIM)).astype(_MM_DTYPE)
    qkv = jnp.dot(h1, wqkv[...], preferred_element_type=f32)      # (ROWS, 3*DIM)

    ctx = []
    for hh in range(HEADS):                                       # static unroll
        lo = hh * HEAD_DIM
        qh = qkv[:, lo:lo + HEAD_DIM].astype(_MM_DTYPE)           # scale folded in Wq
        kh = qkv[:, DIM + lo:DIM + lo + HEAD_DIM].astype(_MM_DTYPE)
        vh = qkv[:, 2 * DIM + lo:2 * DIM + lo + HEAD_DIM].astype(_MM_DTYPE)
        logits = jnp.einsum("qd,kd->qk", qh, kh,
                            preferred_element_type=f32) + bias[...]
        p = _softmax(logits).astype(_MM_DTYPE)
        ctx.append(jnp.dot(p, vh, preferred_element_type=f32))
    ctx = jnp.concatenate(ctx, axis=-1).astype(_MM_DTYPE)         # (ROWS, DIM)

    attn = jnp.dot(ctx, wo[...], preferred_element_type=f32) + vec("attn_bo", DIM)
    x = x + attn

    # --- pre-norm GELU feed-forward -------------------------------------------
    h2 = _layer_norm(x, vec("ln2_w", DIM), vec("ln2_b", DIM)).astype(_MM_DTYPE)
    ff = _gelu(jnp.dot(h2, w1[...], preferred_element_type=f32) + vec("ff_b1", MLP_DIM))
    ff = jnp.dot(ff.astype(_MM_DTYPE), w2[...],
                 preferred_element_type=f32) + vec("ff_b2", DIM)
    x = x + ff

    # --- to_cls_token (x[:, 0]) then mlp_head on the B cls rows only ----------
    xc = jnp.concatenate(
        [x[bb * SEQ_PAD: bb * SEQ_PAD + 1, :] for bb in range(BATCH)], axis=0)
    hl = _layer_norm(xc, vec("head_ln_w", DIM), vec("head_ln_b", DIM)).astype(_MM_DTYPE)
    hmid = _gelu(jnp.dot(hl, hw1[...], preferred_element_type=f32)
                 + vec("head_b1", HEAD_HIDDEN))
    out = jnp.dot(hmid.astype(_MM_DTYPE), hw2[...],
                  preferred_element_type=f32) + vec("head_b2", NUM_CLASSES_PAD)
    o_ref[...] = out                                              # (B, 128) lane-dense


# ----------------------------- parameters -------------------------------------
def init_params(key):
    ks = jax.random.split(key, 12)

    def nrm(k, shape, scale=0.02):
        return (scale * jax.random.normal(k, shape)).astype(jnp.float32)

    ones = lambda s: jnp.ones(s, jnp.float32)
    zeros = lambda s: jnp.zeros(s, jnp.float32)

    return {
        # nn.Parameter(torch.randn(...)) -> standard normal
        "pos_embedding": jax.random.normal(ks[0], (1, SEQ, DIM), jnp.float32),
        "cls_token": jax.random.normal(ks[1], (1, 1, DIM), jnp.float32),
        # patch_to_embedding = Linear(patch_dim, dim); stored (in, out)
        "pe_w": nrm(ks[2], (PATCH_DIM, DIM)), "pe_b": zeros((1, DIM)),
        "transformer": {
            "ln1_w": ones((1, DIM)), "ln1_b": zeros((1, DIM)),
            "wq": nrm(ks[3], (DIM, DIM)),
            "wk": nrm(ks[4], (DIM, DIM)),
            "wv": nrm(ks[5], (DIM, DIM)),
            "wo": nrm(ks[6], (DIM, DIM)), "bo": zeros((1, DIM)),
            "ln2_w": ones((1, DIM)), "ln2_b": zeros((1, DIM)),
            "w1": nrm(ks[7], (DIM, MLP_DIM)), "b1": zeros((1, MLP_DIM)),
            "w2": nrm(ks[8], (MLP_DIM, DIM)), "b2": zeros((1, DIM)),
        },
        "head": {
            "ln_w": ones((1, DIM)), "ln_b": zeros((1, DIM)),
            "w1": nrm(ks[9], (DIM, HEAD_HIDDEN)), "b1": zeros((1, HEAD_HIDDEN)),
            "w2": nrm(ks[10], (HEAD_HIDDEN, NUM_CLASSES)), "b2": zeros((1, NUM_CLASSES)),
        },
    }


def _pack_vecs(params):
    """Pack all small (1, width) vectors into one zero-padded (V, 128) array."""
    tp, hp = params["transformer"], params["head"]
    entries = {
        "ln1_w": tp["ln1_w"], "ln1_b": tp["ln1_b"], "attn_bo": tp["bo"],
        "ln2_w": tp["ln2_w"], "ln2_b": tp["ln2_b"],
        "ff_b1": tp["b1"], "ff_b2": tp["b2"],
        "head_ln_w": hp["ln_w"], "head_ln_b": hp["ln_b"],
        "head_b1": hp["b1"], "head_b2": hp["b2"],
    }
    rows = [jnp.pad(entries[n].reshape(1, -1),
                    ((0, 0), (0, _VEC_W - entries[n].shape[-1])))
            for n in _VEC_NAMES]
    return jnp.concatenate(rows, axis=0).astype(jnp.float32)


# ------------------------------- forward --------------------------------------
def vit_forward(img, params):
    p = PATCH_SIZE
    b, c, H, W = img.shape
    hh, ww = H // p, W // p
    n = hh * ww
    assert b == BATCH and n == NUM_PATCHES and c * p * p == PATCH_DIM

    # einops 'b c (h p1) (w p2) -> b (h w) (p1 p2 c)', then scatter each patch
    # row into its padded slab position (cls row + 3 pad rows per batch block
    # stay zero) -- pure layout plumbing done outside the kernel.
    x = img.reshape(b, c, hh, p, ww, p)
    x = jnp.transpose(x, (0, 2, 4, 3, 5, 1)).reshape(b, n, PATCH_DIM)
    xf = jnp.pad(x, ((0, 0), (1, SEQ_PAD - 1 - n), (0, 0)))
    xf = xf.reshape(ROWS, PATCH_DIM).astype(_MM_DTYPE)

    tp, hp = params["transformer"], params["head"]
    pos = params["pos_embedding"][0]                      # (SEQ, DIM)
    cls = params["cls_token"][0]                          # (1, DIM)

    # constant slab: per batch block = [cls + pos0 | pos1..4 + pe_b | zeros]
    base_blk = jnp.concatenate(
        [cls + pos[0:1],
         pos[1:SEQ] + params["pe_b"],
         jnp.zeros((SEQ_PAD - SEQ, DIM), jnp.float32)], axis=0)
    base = jnp.tile(base_blk, (b, 1))                     # (ROWS, DIM)

    # block-diagonal attention bias (same batch item, key not a pad column);
    # compile-time constant material -- built outside the kernel.
    r = jnp.arange(ROWS)
    same_batch = (r[:, None] // SEQ_PAD) == (r[None, :] // SEQ_PAD)
    key_valid = (r[None, :] % SEQ_PAD) < SEQ
    bias = jnp.where(same_batch & key_valid, 0.0, -1e30).astype(jnp.float32)

    # fused QKV weight with the 1/sqrt(head_dim) scale folded into Q columns
    scale = HEAD_DIM ** -0.5
    wqkv = jnp.concatenate([tp["wq"] * scale, tp["wk"], tp["wv"]], axis=1)

    # pad classifier weight to a lane-dense 128-wide output
    hw2 = jnp.pad(hp["w2"], ((0, 0), (0, NUM_CLASSES_PAD - NUM_CLASSES)))

    cast = lambda a: a.astype(_MM_DTYPE)
    inputs = (
        xf, base, bias, _pack_vecs(params),
        cast(params["pe_w"]), cast(wqkv), cast(tp["wo"]),
        cast(tp["w1"]), cast(tp["w2"]), cast(hp["w1"]), cast(hw2),
    )

    out = pl.pallas_call(
        vit_kernel,
        grid=(1,),
        in_specs=[_full_spec(a.shape) for a in inputs],
        out_specs=_full_spec((b, NUM_CLASSES_PAD)),
        out_shape=jax.ShapeDtypeStruct((b, NUM_CLASSES_PAD), jnp.float32),
    )(*inputs)
    return out[:, :NUM_CLASSES]


# --------------------------------- main ---------------------------------------
if __name__ == "__main__":
    key = jax.random.PRNGKey(0)
    pkey, xkey = jax.random.split(key)
    params = init_params(pkey)
    img = jax.random.normal(
        xkey, (BATCH, CHANNELS, IMAGE_SIZE, IMAGE_SIZE), jnp.float32
    )
    out = vit_forward(img, params)
    out = jax.block_until_ready(out)
    assert out.shape == (BATCH, NUM_CLASSES) and out.dtype == jnp.float32
    print("KERNEL_OK")
</pallas_src>

<mosaic_0001>
module attributes {stable_mosaic.version = 11 : i64} {
  func.func @vit_kernel(%arg0: i32, %arg1: memref<16x256xf32, #tpu.memory_space<vmem>>, %arg2: memref<16x32xf32, #tpu.memory_space<vmem>>, %arg3: memref<16x16xf32, #tpu.memory_space<vmem>>, %arg4: memref<11x128xf32, #tpu.memory_space<vmem>>, %arg5: memref<256x32xf32, #tpu.memory_space<vmem>>, %arg6: memref<32x96xf32, #tpu.memory_space<vmem>>, %arg7: memref<32x32xf32, #tpu.memory_space<vmem>>, %arg8: memref<32x64xf32, #tpu.memory_space<vmem>>, %arg9: memref<64x32xf32, #tpu.memory_space<vmem>>, %arg10: memref<32x128xf32, #tpu.memory_space<vmem>>, %arg11: memref<128x128xf32, #tpu.memory_space<vmem>>, %arg12: memref<2x128xf32, #tpu.memory_space<vmem>>) attributes {dimension_semantics = [#tpu.dimension_semantics<arbitrary>], iteration_bounds = array<i64: 1>, scalar_prefetch = 0 : i64, scratch_operands = 0 : i64, tpu.core_type = #tpu.core_type<tc>, window_params = [{pipeline_mode = #tpu.pipeline_mode<synchronous>, transform_indices = @transform_0, window_bounds = array<i64: 16, 256>}, {pipeline_mode = #tpu.pipeline_mode<synchronous>, transform_indices = @transform_1, window_bounds = array<i64: 16, 32>}, {pipeline_mode = #tpu.pipeline_mode<synchronous>, transform_indices = @transform_2, window_bounds = array<i64: 16, 16>}, {pipeline_mode = #tpu.pipeline_mode<synchronous>, transform_indices = @transform_3, window_bounds = array<i64: 11, 128>}, {pipeline_mode = #tpu.pipeline_mode<synchronous>, transform_indices = @transform_4, window_bounds = array<i64: 256, 32>}, {pipeline_mode = #tpu.pipeline_mode<synchronous>, transform_indices = @transform_5, window_bounds = array<i64: 32, 96>}, {pipeline_mode = #tpu.pipeline_mode<synchronous>, transform_indices = @transform_6, window_bounds = array<i64: 32, 32>}, {pipeline_mode = #tpu.pipeline_mode<synchronous>, transform_indices = @transform_7, window_bounds = array<i64: 32, 64>}, {pipeline_mode = #tpu.pipeline_mode<synchronous>, transform_indices = @transform_8, window_bounds = array<i64: 64, 32>}, {pipeline_mode = #tpu.pipeline_mode<synchronous>, transform_indices = @transform_9, window_bounds = array<i64: 32, 128>}, {pipeline_mode = #tpu.pipeline_mode<synchronous>, transform_indices = @transform_10, window_bounds = array<i64: 128, 128>}, {pipeline_mode = #tpu.pipeline_mode<synchronous>, transform_indices = @transform_11, window_bounds = array<i64: 2, 128>}]} {
    %c0 = arith.constant 0 : index
    %c0_0 = arith.constant 0 : index
    %0 = vector.load %arg2[%c0, %c0_0] : memref<16x32xf32, #tpu.memory_space<vmem>>, vector<16x32xf32>
    %c0_1 = arith.constant 0 : index
    %c0_2 = arith.constant 0 : index
    %1 = vector.load %arg1[%c0_1, %c0_2] : memref<16x256xf32, #tpu.memory_space<vmem>>, vector<16x256xf32>
    %c0_3 = arith.constant 0 : index
    %c0_4 = arith.constant 0 : index
    %2 = vector.load %arg5[%c0_3, %c0_4] : memref<256x32xf32, #tpu.memory_space<vmem>>, vector<256x32xf32>
    %cst = arith.constant dense<0.000000e+00> : vector<16x32xf32>
    %3 = tpu.matmul %1, %2, %cst {dimension_numbers = #tpu.dot_dimension_numbers<[1], [0], [0], [1], [0, 0, 1, 1], [], []>} : vector<16x256xf32>, vector<256x32xf32>, vector<16x32xf32> -> vector<16x32xf32>
    %4 = arith.addf %0, %3 : vector<16x32xf32>
    %c0_5 = arith.constant 0 : index
    %c0_6 = arith.constant 0 : index
    %5 = vector.load %arg4[%c0_5, %c0_6] : memref<11x128xf32, #tpu.memory_space<vmem>>, vector<1x32xf32>
    %c1 = arith.constant 1 : index
    %c0_7 = arith.constant 0 : index
    %6 = vector.load %arg4[%c1, %c0_7] : memref<11x128xf32, #tpu.memory_space<vmem>>, vector<1x32xf32>
    %cst_8 = arith.constant dense<0.000000e+00> : vector<16xf32>
    %7 = vector.multi_reduction <add>, %4, %cst_8 [1] : vector<16x32xf32> to vector<16xf32>
    %8 = vector.shape_cast %7 : vector<16xf32> to vector<16x1xf32>
    %cst_9 = arith.constant 3.200000e+01 : f32
    %9 = vector.broadcast %cst_9 : f32 to vector<16x1xf32>
    %10 = arith.divf %8, %9 : vector<16x1xf32>
    %11 = vector.broadcast %10 : vector<16x1xf32> to vector<16x32xf32>
    %12 = arith.subf %4, %11 : vector<16x32xf32>
    %13 = arith.mulf %12, %12 : vector<16x32xf32>
    %cst_10 = arith.constant dense<0.000000e+00> : vector<16xf32>
    %14 = vector.multi_reduction <add>, %13, %cst_10 [1] : vector<16x32xf32> to vector<16xf32>
    %15 = vector.shape_cast %14 : vector<16xf32> to vector<16x1xf32>
    %cst_11 = arith.constant 3.200000e+01 : f32
    %16 = vector.broadcast %cst_11 : f32 to vector<16x1xf32>
    %17 = arith.divf %15, %16 : vector<16x1xf32>
    %18 = vector.broadcast %10 : vector<16x1xf32> to vector<16x32xf32>
    %19 = arith.subf %4, %18 : vector<16x32xf32>
    %cst_12 = arith.constant 9.99999974E-6 : f32
    %20 = vector.broadcast %cst_12 : f32 to vector<16x1xf32>
    %21 = arith.addf %17, %20 : vector<16x1xf32>
    %22 = math.rsqrt %21 : vector<16x1xf32>
    %23 = vector.broadcast %22 : vector<16x1xf32> to vector<16x32xf32>
    %24 = arith.mulf %19, %23 : vector<16x32xf32>
    %25 = vector.broadcast %5 : vector<1x32xf32> to vector<16x32xf32>
    %26 = arith.mulf %24, %25 : vector<16x32xf32>
    %27 = vector.broadcast %6 : vector<1x32xf32> to vector<16x32xf32>
    %28 = arith.addf %26, %27 : vector<16x32xf32>
    %c0_13 = arith.constant 0 : index
    %c0_14 = arith.constant 0 : index
    %29 = vector.load %arg6[%c0_13, %c0_14] : memref<32x96xf32, #tpu.memory_space<vmem>>, vector<32x96xf32>
    %cst_15 = arith.constant dense<0.000000e+00> : vector<16x96xf32>
    %30 = tpu.matmul %28, %29, %cst_15 {dimension_numbers = #tpu.dot_dimension_numbers<[1], [0], [0], [1], [0, 0, 1, 1], [], []>} : vector<16x32xf32>, vector<32x96xf32>, vector<16x96xf32> -> vector<16x96xf32>
    %31 = vector.extract_strided_slice %30 {offsets = [0, 0], sizes = [16, 8], strides = [1, 1]} : vector<16x96xf32> to vector<16x8xf32>
    %32 = vector.extract_strided_slice %30 {offsets = [0, 32], sizes = [16, 8], strides = [1, 1]} : vector<16x96xf32> to vector<16x8xf32>
    %33 = vector.extract_strided_slice %30 {offsets = [0, 64], sizes = [16, 8], strides = [1, 1]} : vector<16x96xf32> to vector<16x8xf32>
    "tpu.trace_start"() <{level = 10 : i32, message = "qd,kd->qk"}> : () -> ()
    %cst_16 = arith.constant dense<0.000000e+00> : vector<16x16xf32>
    %34 = tpu.matmul %31, %32, %cst_16 {dimension_numbers = #tpu.dot_dimension_numbers<[1], [1], [0], [0], [0, 0, 1, 0], [], []>} : vector<16x8xf32>, vector<16x8xf32>, vector<16x16xf32> -> vector<16x16xf32>
    "tpu.trace_stop"() : () -> ()
    %c0_17 = arith.constant 0 : index
    %c0_18 = arith.constant 0 : index
    %35 = vector.load %arg3[%c0_17, %c0_18] : memref<16x16xf32, #tpu.memory_space<vmem>>, vector<16x16xf32>
    %36 = arith.addf %34, %35 : vector<16x16xf32>
    %cst_19 = arith.constant dense<0xFF800000> : vector<16xf32>
    %37 = vector.multi_reduction <maximumf>, %36, %cst_19 [1] : vector<16x16xf32> to vector<16xf32>
    %38 = vector.shape_cast %37 : vector<16xf32> to vector<16x1xf32>
    %39 = vector.broadcast %38 : vector<16x1xf32> to vector<16x16xf32>
    %40 = arith.subf %36, %39 : vector<16x16xf32>
    %41 = math.exp %40 : vector<16x16xf32>
    %cst_20 = arith.constant dense<0.000000e+00> : vector<16xf32>
    %42 = vector.multi_reduction <add>, %41, %cst_20 [1] : vector<16x16xf32> to vector<16xf32>
    %43 = vector.shape_cast %42 : vector<16xf32> to vector<16x1xf32>
    %44 = tpu.reciprocal %43 {approx = true} : vector<16x1xf32> -> vector<16x1xf32>
    %45 = vector.broadcast %44 : vector<16x1xf32> to vector<16x16xf32>
    %46 = arith.mulf %41, %45 : vector<16x16xf32>
    %cst_21 = arith.constant dense<0.000000e+00> : vector<16x8xf32>
    %47 = tpu.matmul %46, %33, %cst_21 {dimension_numbers = #tpu.dot_dimension_numbers<[1], [0], [0], [1], [0, 0, 1, 1], [], []>} : vector<16x16xf32>, vector<16x8xf32>, vector<16x8xf32> -> vector<16x8xf32>
    %48 = vector.extract_strided_slice %30 {offsets = [0, 8], sizes = [16, 8], strides = [1, 1]} : vector<16x96xf32> to vector<16x8xf32>
    %49 = vector.extract_strided_slice %30 {offsets = [0, 40], sizes = [16, 8], strides = [1, 1]} : vector<16x96xf32> to vector<16x8xf32>
    %50 = vector.extract_strided_slice %30 {offsets = [0, 72], sizes = [16, 8], strides = [1, 1]} : vector<16x96xf32> to vector<16x8xf32>
    "tpu.trace_start"() <{level = 10 : i32, message = "qd,kd->qk"}> : () -> ()
    %cst_22 = arith.constant dense<0.000000e+00> : vector<16x16xf32>
    %51 = tpu.matmul %48, %49, %cst_22 {dimension_numbers = #tpu.dot_dimension_numbers<[1], [1], [0], [0], [0, 0, 1, 0], [], []>} : vector<16x8xf32>, vector<16x8xf32>, vector<16x16xf32> -> vector<16x16xf32>
    "tpu.trace_stop"() : () -> ()
    %c0_23 = arith.constant 0 : index
    %c0_24 = arith.constant 0 : index
    %52 = vector.load %arg3[%c0_23, %c0_24] : memref<16x16xf32, #tpu.memory_space<vmem>>, vector<16x16xf32>
    %53 = arith.addf %51, %52 : vector<16x16xf32>
    %cst_25 = arith.constant dense<0xFF800000> : vector<16xf32>
    %54 = vector.multi_reduction <maximumf>, %53, %cst_25 [1] : vector<16x16xf32> to vector<16xf32>
    %55 = vector.shape_cast %54 : vector<16xf32> to vector<16x1xf32>
    %56 = vector.broadcast %55 : vector<16x1xf32> to vector<16x16xf32>
    %57 = arith.subf %53, %56 : vector<16x16xf32>
    %58 = math.exp %57 : vector<16x16xf32>
    %cst_26 = arith.constant dense<0.000000e+00> : vector<16xf32>
    %59 = vector.multi_reduction <add>, %58, %cst_26 [1] : vector<16x16xf32> to vector<16xf32>
    %60 = vector.shape_cast %59 : vector<16xf32> to vector<16x1xf32>
    %61 = tpu.reciprocal %60 {approx = true} : vector<16x1xf32> -> vector<16x1xf32>
    %62 = vector.broadcast %61 : vector<16x1xf32> to vector<16x16xf32>
    %63 = arith.mulf %58, %62 : vector<16x16xf32>
    %cst_27 = arith.constant dense<0.000000e+00> : vector<16x8xf32>
    %64 = tpu.matmul %63, %50, %cst_27 {dimension_numbers = #tpu.dot_dimension_numbers<[1], [0], [0], [1], [0, 0, 1, 1], [], []>} : vector<16x16xf32>, vector<16x8xf32>, vector<16x8xf32> -> vector<16x8xf32>
    %65 = vector.extract_strided_slice %30 {offsets = [0, 16], sizes = [16, 8], strides = [1, 1]} : vector<16x96xf32> to vector<16x8xf32>
    %66 = vector.extract_strided_slice %30 {offsets = [0, 48], sizes = [16, 8], strides = [1, 1]} : vector<16x96xf32> to vector<16x8xf32>
    %67 = vector.extract_strided_slice %30 {offsets = [0, 80], sizes = [16, 8], strides = [1, 1]} : vector<16x96xf32> to vector<16x8xf32>
    "tpu.trace_start"() <{level = 10 : i32, message = "qd,kd->qk"}> : () -> ()
    %cst_28 = arith.constant dense<0.000000e+00> : vector<16x16xf32>
    %68 = tpu.matmul %65, %66, %cst_28 {dimension_numbers = #tpu.dot_dimension_numbers<[1], [1], [0], [0], [0, 0, 1, 0], [], []>} : vector<16x8xf32>, vector<16x8xf32>, vector<16x16xf32> -> vector<16x16xf32>
    "tpu.trace_stop"() : () -> ()
    %c0_29 = arith.constant 0 : index
    %c0_30 = arith.constant 0 : index
    %69 = vector.load %arg3[%c0_29, %c0_30] : memref<16x16xf32, #tpu.memory_space<vmem>>, vector<16x16xf32>
    %70 = arith.addf %68, %69 : vector<16x16xf32>
    %cst_31 = arith.constant dense<0xFF800000> : vector<16xf32>
    %71 = vector.multi_reduction <maximumf>, %70, %cst_31 [1] : vector<16x16xf32> to vector<16xf32>
    %72 = vector.shape_cast %71 : vector<16xf32> to vector<16x1xf32>
    %73 = vector.broadcast %72 : vector<16x1xf32> to vector<16x16xf32>
    %74 = arith.subf %70, %73 : vector<16x16xf32>
    %75 = math.exp %74 : vector<16x16xf32>
    %cst_32 = arith.constant dense<0.000000e+00> : vector<16xf32>
    %76 = vector.multi_reduction <add>, %75, %cst_32 [1] : vector<16x16xf32> to vector<16xf32>
    %77 = vector.shape_cast %76 : vector<16xf32> to vector<16x1xf32>
    %78 = tpu.reciprocal %77 {approx = true} : vector<16x1xf32> -> vector<16x1xf32>
    %79 = vector.broadcast %78 : vector<16x1xf32> to vector<16x16xf32>
    %80 = arith.mulf %75, %79 : vector<16x16xf32>
    %cst_33 = arith.constant dense<0.000000e+00> : vector<16x8xf32>
    %81 = tpu.matmul %80, %67, %cst_33 {dimension_numbers = #tpu.dot_dimension_numbers<[1], [0], [0], [1], [0, 0, 1, 1], [], []>} : vector<16x16xf32>, vector<16x8xf32>, vector<16x8xf32> -> vector<16x8xf32>
    %82 = vector.extract_strided_slice %30 {offsets = [0, 24], sizes = [16, 8], strides = [1, 1]} : vector<16x96xf32> to vector<16x8xf32>
    %83 = vector.extract_strided_slice %30 {offsets = [0, 56], sizes = [16, 8], strides = [1, 1]} : vector<16x96xf32> to vector<16x8xf32>
    %84 = vector.extract_strided_slice %30 {offsets = [0, 88], sizes = [16, 8], strides = [1, 1]} : vector<16x96xf32> to vector<16x8xf32>
    "tpu.trace_start"() <{level = 10 : i32, message = "qd,kd->qk"}> : () -> ()
    %cst_34 = arith.constant dense<0.000000e+00> : vector<16x16xf32>
    %85 = tpu.matmul %82, %83, %cst_34 {dimension_numbers = #tpu.dot_dimension_numbers<[1], [1], [0], [0], [0, 0, 1, 0], [], []>} : vector<16x8xf32>, vector<16x8xf32>, vector<16x16xf32> -> vector<16x16xf32>
    "tpu.trace_stop"() : () -> ()
    %c0_35 = arith.constant 0 : index
    %c0_36 = arith.constant 0 : index
    %86 = vector.load %arg3[%c0_35, %c0_36] : memref<16x16xf32, #tpu.memory_space<vmem>>, vector<16x16xf32>
    %87 = arith.addf %85, %86 : vector<16x16xf32>
    %cst_37 = arith.constant dense<0xFF800000> : vector<16xf32>
    %88 = vector.multi_reduction <maximumf>, %87, %cst_37 [1] : vector<16x16xf32> to vector<16xf32>
    %89 = vector.shape_cast %88 : vector<16xf32> to vector<16x1xf32>
    %90 = vector.broadcast %89 : vector<16x1xf32> to vector<16x16xf32>
    %91 = arith.subf %87, %90 : vector<16x16xf32>
    %92 = math.exp %91 : vector<16x16xf32>
    %cst_38 = arith.constant dense<0.000000e+00> : vector<16xf32>
    %93 = vector.multi_reduction <add>, %92, %cst_38 [1] : vector<16x16xf32> to vector<16xf32>
    %94 = vector.shape_cast %93 : vector<16xf32> to vector<16x1xf32>
    %95 = tpu.reciprocal %94 {approx = true} : vector<16x1xf32> -> vector<16x1xf32>
    %96 = vector.broadcast %95 : vector<16x1xf32> to vector<16x16xf32>
    %97 = arith.mulf %92, %96 : vector<16x16xf32>
    %cst_39 = arith.constant dense<0.000000e+00> : vector<16x8xf32>
    %98 = tpu.matmul %97, %84, %cst_39 {dimension_numbers = #tpu.dot_dimension_numbers<[1], [0], [0], [1], [0, 0, 1, 1], [], []>} : vector<16x16xf32>, vector<16x8xf32>, vector<16x8xf32> -> vector<16x8xf32>
    %99 = tpu.concatenate %47, %64, %81, %98 in 1 : vector<16x8xf32>, vector<16x8xf32>, vector<16x8xf32>, vector<16x8xf32> -> vector<16x32xf32>
    %c0_40 = arith.constant 0 : index
    %c0_41 = arith.constant 0 : index
    %100 = vector.load %arg7[%c0_40, %c0_41] : memref<32x32xf32, #tpu.memory_space<vmem>>, vector<32x32xf32>
    %cst_42 = arith.constant dense<0.000000e+00> : vector<16x32xf32>
    %101 = tpu.matmul %99, %100, %cst_42 {dimension_numbers = #tpu.dot_dimension_numbers<[1], [0], [0], [1], [0, 0, 1, 1], [], []>} : vector<16x32xf32>, vector<32x32xf32>, vector<16x32xf32> -> vector<16x32xf32>
    %c2 = arith.constant 2 : index
    %c0_43 = arith.constant 0 : index
    %102 = vector.load %arg4[%c2, %c0_43] : memref<11x128xf32, #tpu.memory_space<vmem>>, vector<1x32xf32>
    %103 = vector.broadcast %102 : vector<1x32xf32> to vector<16x32xf32>
    %104 = arith.addf %101, %103 : vector<16x32xf32>
    %105 = arith.addf %4, %104 : vector<16x32xf32>
    %c3 = arith.constant 3 : index
    %c0_44 = arith.constant 0 : index
    %106 = vector.load %arg4[%c3, %c0_44] : memref<11x128xf32, #tpu.memory_space<vmem>>, vector<1x32xf32>
    %c4 = arith.constant 4 : index
    %c0_45 = arith.constant 0 : index
    %107 = vector.load %arg4[%c4, %c0_45] : memref<11x128xf32, #tpu.memory_space<vmem>>, vector<1x32xf32>
    %cst_46 = arith.constant dense<0.000000e+00> : vector<16xf32>
    %108 = vector.multi_reduction <add>, %105, %cst_46 [1] : vector<16x32xf32> to vector<16xf32>
    %109 = vector.shape_cast %108 : vector<16xf32> to vector<16x1xf32>
    %cst_47 = arith.constant 3.200000e+01 : f32
    %110 = vector.broadcast %cst_47 : f32 to vector<16x1xf32>
    %111 = arith.divf %109, %110 : vector<16x1xf32>
    %112 = vector.broadcast %111 : vector<16x1xf32> to vector<16x32xf32>
    %113 = arith.subf %105, %112 : vector<16x32xf32>
    %114 = arith.mulf %113, %113 : vector<16x32xf32>
    %cst_48 = arith.constant dense<0.000000e+00> : vector<16xf32>
    %115 = vector.multi_reduction <add>, %114, %cst_48 [1] : vector<16x32xf32> to vector<16xf32>
    %116 = vector.shape_cast %115 : vector<16xf32> to vector<16x1xf32>
    %cst_49 = arith.constant 3.200000e+01 : f32
    %117 = vector.broadcast %cst_49 : f32 to vector<16x1xf32>
    %118 = arith.divf %116, %117 : vector<16x1xf32>
    %119 = vector.broadcast %111 : vector<16x1xf32> to vector<16x32xf32>
    %120 = arith.subf %105, %119 : vector<16x32xf32>
    %cst_50 = arith.constant 9.99999974E-6 : f32
    %121 = vector.broadcast %cst_50 : f32 to vector<16x1xf32>
    %122 = arith.addf %118, %121 : vector<16x1xf32>
    %123 = math.rsqrt %122 : vector<16x1xf32>
    %124 = vector.broadcast %123 : vector<16x1xf32> to vector<16x32xf32>
    %125 = arith.mulf %120, %124 : vector<16x32xf32>
    %126 = vector.broadcast %106 : vector<1x32xf32> to vector<16x32xf32>
    %127 = arith.mulf %125, %126 : vector<16x32xf32>
    %128 = vector.broadcast %107 : vector<1x32xf32> to vector<16x32xf32>
    %129 = arith.addf %127, %128 : vector<16x32xf32>
    %c0_51 = arith.constant 0 : index
    %c0_52 = arith.constant 0 : index
    %130 = vector.load %arg8[%c0_51, %c0_52] : memref<32x64xf32, #tpu.memory_space<vmem>>, vector<32x64xf32>
    %cst_53 = arith.constant dense<0.000000e+00> : vector<16x64xf32>
    %131 = tpu.matmul %129, %130, %cst_53 {dimension_numbers = #tpu.dot_dimension_numbers<[1], [0], [0], [1], [0, 0, 1, 1], [], []>} : vector<16x32xf32>, vector<32x64xf32>, vector<16x64xf32> -> vector<16x64xf32>
    %c5 = arith.constant 5 : index
    %c0_54 = arith.constant 0 : index
    %132 = vector.load %arg4[%c5, %c0_54] : memref<11x128xf32, #tpu.memory_space<vmem>>, vector<1x64xf32>
    %133 = vector.broadcast %132 : vector<1x64xf32> to vector<16x64xf32>
    %134 = arith.addf %131, %133 : vector<16x64xf32>
    %cst_55 = arith.constant 5.000000e-01 : f32
    %135 = vector.broadcast %cst_55 : f32 to vector<16x64xf32>
    %136 = arith.mulf %135, %134 : vector<16x64xf32>
    %cst_56 = arith.constant 0.707106769 : f32
    %137 = vector.broadcast %cst_56 : f32 to vector<16x64xf32>
    %138 = arith.mulf %134, %137 : vector<16x64xf32>
    %139 = math.erf %138 : vector<16x64xf32>
    %cst_57 = arith.constant 1.000000e+00 : f32
    %140 = vector.broadcast %cst_57 : f32 to vector<16x64xf32>
    %141 = arith.addf %140, %139 : vector<16x64xf32>
    %142 = arith.mulf %136, %141 : vector<16x64xf32>
    %c0_58 = arith.constant 0 : index
    %c0_59 = arith.constant 0 : index
    %143 = vector.load %arg9[%c0_58, %c0_59] : memref<64x32xf32, #tpu.memory_space<vmem>>, vector<64x32xf32>
    %cst_60 = arith.constant dense<0.000000e+00> : vector<16x32xf32>
    %144 = tpu.matmul %142, %143, %cst_60 {dimension_numbers = #tpu.dot_dimension_numbers<[1], [0], [0], [1], [0, 0, 1, 1], [], []>} : vector<16x64xf32>, vector<64x32xf32>, vector<16x32xf32> -> vector<16x32xf32>
    %c6 = arith.constant 6 : index
    %c0_61 = arith.constant 0 : index
    %145 = vector.load %arg4[%c6, %c0_61] : memref<11x128xf32, #tpu.memory_space<vmem>>, vector<1x32xf32>
    %146 = vector.broadcast %145 : vector<1x32xf32> to vector<16x32xf32>
    %147 = arith.addf %144, %146 : vector<16x32xf32>
    %148 = arith.addf %105, %147 : vector<16x32xf32>
    %149 = vector.extract_strided_slice %148 {offsets = [0, 0], sizes = [1, 32], strides = [1, 1]} : vector<16x32xf32> to vector<1x32xf32>
    %150 = vector.extract_strided_slice %148 {offsets = [8, 0], sizes = [1, 32], strides = [1, 1]} : vector<16x32xf32> to vector<1x32xf32>
    %151 = tpu.concatenate %149, %150 in 0 : vector<1x32xf32>, vector<1x32xf32> -> vector<2x32xf32>
    %c7 = arith.constant 7 : index
    %c0_62 = arith.constant 0 : index
    %152 = vector.load %arg4[%c7, %c0_62] : memref<11x128xf32, #tpu.memory_space<vmem>>, vector<1x32xf32>
    %c8 = arith.constant 8 : index
    %c0_63 = arith.constant 0 : index
    %153 = vector.load %arg4[%c8, %c0_63] : memref<11x128xf32, #tpu.memory_space<vmem>>, vector<1x32xf32>
    %cst_64 = arith.constant dense<0.000000e+00> : vector<2xf32>
    %154 = vector.multi_reduction <add>, %151, %cst_64 [1] : vector<2x32xf32> to vector<2xf32>
    %155 = vector.shape_cast %154 : vector<2xf32> to vector<2x1xf32>
    %cst_65 = arith.constant 3.200000e+01 : f32
    %156 = vector.broadcast %cst_65 : f32 to vector<2x1xf32>
    %157 = arith.divf %155, %156 : vector<2x1xf32>
    %158 = vector.broadcast %157 : vector<2x1xf32> to vector<2x32xf32>
    %159 = arith.subf %151, %158 : vector<2x32xf32>
    %160 = arith.mulf %159, %159 : vector<2x32xf32>
    %cst_66 = arith.constant dense<0.000000e+00> : vector<2xf32>
    %161 = vector.multi_reduction <add>, %160, %cst_66 [1] : vector<2x32xf32> to vector<2xf32>
    %162 = vector.shape_cast %161 : vector<2xf32> to vector<2x1xf32>
    %cst_67 = arith.constant 3.200000e+01 : f32
    %163 = vector.broadcast %cst_67 : f32 to vector<2x1xf32>
    %164 = arith.divf %162, %163 : vector<2x1xf32>
    %165 = vector.broadcast %157 : vector<2x1xf32> to vector<2x32xf32>
    %166 = arith.subf %151, %165 : vector<2x32xf32>
    %cst_68 = arith.constant 9.99999974E-6 : f32
    %167 = vector.broadcast %cst_68 : f32 to vector<2x1xf32>
    %168 = arith.addf %164, %167 : vector<2x1xf32>
    %169 = math.rsqrt %168 : vector<2x1xf32>
    %170 = vector.broadcast %169 : vector<2x1xf32> to vector<2x32xf32>
    %171 = arith.mulf %166, %170 : vector<2x32xf32>
    %172 = vector.broadcast %152 : vector<1x32xf32> to vector<2x32xf32>
    %173 = arith.mulf %171, %172 : vector<2x32xf32>
    %174 = vector.broadcast %153 : vector<1x32xf32> to vector<2x32xf32>
    %175 = arith.addf %173, %174 : vector<2x32xf32>
    %c0_69 = arith.constant 0 : index
    %c0_70 = arith.constant 0 : index
    %176 = vector.load %arg10[%c0_69, %c0_70] : memref<32x128xf32, #tpu.memory_space<vmem>>, vector<32x128xf32>
    %cst_71 = arith.constant dense<0.000000e+00> : vector<2x128xf32>
    %177 = tpu.matmul %175, %176, %cst_71 {dimension_numbers = #tpu.dot_dimension_numbers<[1], [0], [0], [1], [0, 0, 1, 1], [], []>} : vector<2x32xf32>, vector<32x128xf32>, vector<2x128xf32> -> vector<2x128xf32>
    %c9 = arith.constant 9 : index
    %c0_72 = arith.constant 0 : index
    %178 = vector.load %arg4[%c9, %c0_72] : memref<11x128xf32, #tpu.memory_space<vmem>>, vector<1x128xf32>
    %179 = vector.broadcast %178 : vector<1x128xf32> to vector<2x128xf32>
    %180 = arith.addf %177, %179 : vector<2x128xf32>
    %cst_73 = arith.constant 5.000000e-01 : f32
    %181 = vector.broadcast %cst_73 : f32 to vector<2x128xf32>
    %182 = arith.mulf %181, %180 : vector<2x128xf32>
    %cst_74 = arith.constant 0.707106769 : f32
    %183 = vector.broadcast %cst_74 : f32 to vector<2x128xf32>
    %184 = arith.mulf %180, %183 : vector<2x128xf32>
    %185 = math.erf %184 : vector<2x128xf32>
    %cst_75 = arith.constant 1.000000e+00 : f32
    %186 = vector.broadcast %cst_75 : f32 to vector<2x128xf32>
    %187 = arith.addf %186, %185 : vector<2x128xf32>
    %188 = arith.mulf %182, %187 : vector<2x128xf32>
    %c0_76 = arith.constant 0 : index
    %c0_77 = arith.constant 0 : index
    %189 = vector.load %arg11[%c0_76, %c0_77] : memref<128x128xf32, #tpu.memory_space<vmem>>, vector<128x128xf32>
    %cst_78 = arith.constant dense<0.000000e+00> : vector<2x128xf32>
    %190 = tpu.matmul %188, %189, %cst_78 {dimension_numbers = #tpu.dot_dimension_numbers<[1], [0], [0], [1], [0, 0, 1, 1], [], []>} : vector<2x128xf32>, vector<128x128xf32>, vector<2x128xf32> -> vector<2x128xf32>
    %c10 = arith.constant 10 : index
    %c0_79 = arith.constant 0 : index
    %191 = vector.load %arg4[%c10, %c0_79] : memref<11x128xf32, #tpu.memory_space<vmem>>, vector<1x128xf32>
    %192 = vector.broadcast %191 : vector<1x128xf32> to vector<2x128xf32>
    %193 = arith.addf %190, %192 : vector<2x128xf32>
    %c0_80 = arith.constant 0 : index
    %c0_81 = arith.constant 0 : index
    %194 = vector.load %arg12[%c0_80, %c0_81] : memref<2x128xf32, #tpu.memory_space<vmem>>, vector<2x128xf32>
    tpu.vector_store %arg12[%c0_80, %c0_81], %193 {strides = array<i32>} : memref<2x128xf32, #tpu.memory_space<vmem>>, vector<2x128xf32>,
    return
  }
  func.func @transform_0(%arg0: i32) -> (i32, i32) {
    %c0_i32 = arith.constant 0 : i32
    %c0_i32_0 = arith.constant 0 : i32
    %c0_i32_1 = arith.constant 0 : i32
    return %c0_i32, %c0_i32_0 : i32, i32
  }
  func.func @transform_1(%arg0: i32) -> (i32, i32) {
    %c0_i32 = arith.constant 0 : i32
    %c0_i32_0 = arith.constant 0 : i32
    %c0_i32_1 = arith.constant 0 : i32
    return %c0_i32, %c0_i32_0 : i32, i32
  }
  func.func @transform_2(%arg0: i32) -> (i32, i32) {
    %c0_i32 = arith.constant 0 : i32
    %c0_i32_0 = arith.constant 0 : i32
    %c0_i32_1 = arith.constant 0 : i32
    return %c0_i32, %c0_i32_0 : i32, i32
  }
  func.func @transform_3(%arg0: i32) -> (i32, i32) {
    %c0_i32 = arith.constant 0 : i32
    %c0_i32_0 = arith.constant 0 : i32
    %c0_i32_1 = arith.constant 0 : i32
    return %c0_i32, %c0_i32_0 : i32, i32
  }
  func.func @transform_4(%arg0: i32) -> (i32, i32) {
    %c0_i32 = arith.constant 0 : i32
    %c0_i32_0 = arith.constant 0 : i32
    %c0_i32_1 = arith.constant 0 : i32
    return %c0_i32, %c0_i32_0 : i32, i32
  }
  func.func @transform_5(%arg0: i32) -> (i32, i32) {
    %c0_i32 = arith.constant 0 : i32
    %c0_i32_0 = arith.constant 0 : i32
    %c0_i32_1 = arith.constant 0 : i32
    return %c0_i32, %c0_i32_0 : i32, i32
  }
  func.func @transform_6(%arg0: i32) -> (i32, i32) {
    %c0_i32 = arith.constant 0 : i32
    %c0_i32_0 = arith.constant 0 : i32
    %c0_i32_1 = arith.constant 0 : i32
    return %c0_i32, %c0_i32_0 : i32, i32
  }
  func.func @transform_7(%arg0: i32) -> (i32, i32) {
    %c0_i32 = arith.constant 0 : i32
    %c0_i32_0 = arith.constant 0 : i32
    %c0_i32_1 = arith.constant 0 : i32
    return %c0_i32, %c0_i32_0 : i32, i32
  }
  func.func @transform_8(%arg0: i32) -> (i32, i32) {
    %c0_i32 = arith.constant 0 : i32
    %c0_i32_0 = arith.constant 0 : i32
    %c0_i32_1 = arith.constant 0 : i32
    return %c0_i32, %c0_i32_0 : i32, i32
  }
  func.func @transform_9(%arg0: i32) -> (i32, i32) {
    %c0_i32 = arith.constant 0 : i32
    %c0_i32_0 = arith.constant 0 : i32
    %c0_i32_1 = arith.constant 0 : i32
    return %c0_i32, %c0_i32_0 : i32, i32
  }
  func.func @transform_10(%arg0: i32) -> (i32, i32) {
    %c0_i32 = arith.constant 0 : i32
    %c0_i32_0 = arith.constant 0 : i32
    %c0_i32_1 = arith.constant 0 : i32
    return %c0_i32, %c0_i32_0 : i32, i32
  }
  func.func @transform_11(%arg0: i32) -> (i32, i32) {
    %c0_i32 = arith.constant 0 : i32
    %c0_i32_0 = arith.constant 0 : i32
    %c0_i32_1 = arith.constant 0 : i32
    return %c0_i32, %c0_i32_0 : i32, i32
  }
}

</mosaic_0001>

<bundles_post_ra>
// kernel: tpu_custom_call.1
= control target key start
LH: loop header
LB: loop body
LE: loop exit
PB: predicated region body
PF: predicated region fallthrough
CT: control target
= control target key end

     0   :  { %s2771_s0 = inlined_call_operand.vmem [shape: f32[16,256], index: 0, kind: input, shape index: {}]   ;;  %s2772_s1 = inlined_call_operand.vmem [shape: f32[16,32], index: 1, kind: input, shape index: {}]   ;;  %s2773_s2 = inlined_call_operand.vmem [shape: f32[16,16], index: 2, kind: input, shape index: {}]   ;;  %s2774_s3 = inlined_call_operand.vmem [shape: f32[11,128], index: 3, kind: input, shape index: {}]   ;;  %s2775_s4 = inlined_call_operand.vmem [shape: f32[256,32], index: 4, kind: input, shape index: {}]   ;;  %s2776_s5 = inlined_call_operand.vmem [shape: f32[32,96], index: 5, kind: input, shape index: {}]   ;;  %s2777_s6 = inlined_call_operand.vmem [shape: f32[32,32], index: 6, kind: input, shape index: {}]   ;;  %s2778_s7 = inlined_call_operand.vmem [shape: f32[32,64], index: 7, kind: input, shape index: {}]   ;;  %s2779_s8 = inlined_call_operand.vmem [shape: f32[64,32], index: 8, kind: input, shape index: {}]   ;;  %s2780_s9 = inlined_call_operand.vmem [shape: f32[32,128], index: 9, kind: input, shape index: {}]   ;;  %s2781_s10 = inlined_call_operand.vmem [shape: f32[128,128], index: 10, kind: input, shape index: {}]   ;;  %s2782_s11 = inlined_call_operand.hbm [shape: f32[2,128], index: 11, kind: output, shape index: {}]  }
   0x1   :  { %v61_v0 = vld [vmem:[%s2775_s4 + $0x80] sm:$0xff]  ;;  %v62_v1 = vld [vmem:[%s2775_s4 + $0x88] sm:$0xff]  ;;  %v63_v5 = vld [vmem:[%s2775_s4 + $0x90] sm:$0xff] }
   0x2   :  { %v45_v2 = vld [vmem:[%s2775_s4] sm:$0xff]  ;;  %v1991_v3 = vpack.c.bf16 %v62_v1, %v61_v0  ;;  %v46_v4 = vld [vmem:[%s2775_s4 + $0x8] sm:$0xff]  ;;  %v64_v6 = vld [vmem:[%s2775_s4 + $0x98] sm:$0xff] }
   0x3   :  { %v1993_v7 = vpack.c.bf16 %v46_v4, %v45_v2  ;;  %v1995_v8 = vpack.c.bf16 %v64_v6, %v63_v5  ;;  %v47_v9 = vld [vmem:[%s2775_s4 + $0x10] sm:$0xff]  ;;  %v48_v10 = vld [vmem:[%s2775_s4 + $0x18] sm:$0xff]  ;;  %v65_v11 = vld [vmem:[%s2775_s4 + $0xa0] sm:$0xff] }
   0x4   :  { %1992 = vmatprep.subr.bf16.mxu0 %v1991_v3  ;;  %v66_v12 = vld [vmem:[%s2775_s4 + $0xa8] sm:$0xff]  ;;  %v1997_v13 = vpack.c.bf16 %v48_v10, %v47_v9  ;;  %v49_v15 = vld [vmem:[%s2775_s4 + $0x20] sm:$0xff]  ;;  %v67_v17 = vld [vmem:[%s2775_s4 + $0xb0] sm:$0xff] }
   0x5   :  { %1994 = vmatpush3.bf16.msra.mxu0 %v1993_v7  ;;  %v1999_v14 = vpack.c.bf16 %v66_v12, %v65_v11  ;;  %v50_v16 = vld [vmem:[%s2775_s4 + $0x28] sm:$0xff]  ;;  %v68_v18 = vld [vmem:[%s2775_s4 + $0xb8] sm:$0xff]  ;;  %v51_v21 = vld [vmem:[%s2775_s4 + $0x30] sm:$0xff] }
   0x6   :  { %1996 = vmatprep.subr.bf16.mxu0 %v1995_v8  ;;  %v2001_v19 = vpack.c.bf16 %v50_v16, %v49_v15  ;;  %v2003_v20 = vpack.c.bf16 %v68_v18, %v67_v17  ;;  %v52_v22 = vld [vmem:[%s2775_s4 + $0x38] sm:$0xff]  ;;  %v69_v23 = vld [vmem:[%s2775_s4 + $0xc0] sm:$0xff]  ;;  %v70_v24 = vld [vmem:[%s2775_s4 + $0xc8] sm:$0xff] }
   0x7   :  { %v42_v25 = vld [vmem:[%s2771_s0 + $0x8] sm:$0xff]  ;;  %v2005_v26 = vpack.c.bf16 %v52_v22, %v51_v21 }
   0x8   :  { %141 = vmatprep.mubr.f32.mxu0 %v42_v25 }
   0x9   :  { %1998 = vmatpush3.bf16.msra.mxu0 %v1997_v13 }
   0xa   :  { %2000 = vmatprep.subr.bf16.mxu0 %v1999_v14 }
   0xd   :  { %2002 = vmatpush3.bf16.msra.mxu0 %v2001_v19 }
   0xe   :  { %16 = vsyncpa [#allocation3], 0  ;;  %2004 = vmatprep.subr.bf16.mxu0 %v2003_v20  ;;  %v2007_v27 = vpack.c.bf16 %v70_v24, %v69_v23  ;;  %v53_v28 = vld [vmem:[%s2775_s4 + $0x40] sm:$0xff]  ;;  %v54_v29 = vld [vmem:[%s2775_s4 + $0x48] sm:$0xff]  ;;  %vm156_vm0 = vcmask 261120   ;;  %vm289_vm1 = vcmask 64512  }
   0xf   :  { %v71_v30 = vld [vmem:[%s2775_s4 + $0xd0] sm:$0xff]  ;;  %v72_v31 = vld [vmem:[%s2775_s4 + $0xd8] sm:$0xff]  ;;  %v2009_v32 = vpack.c.bf16 %v54_v29, %v53_v28  ;;  %v73_v36 = vld [vmem:[%s2775_s4 + $0xe0] sm:$0xff]  ;;  %s2264_s26 = smov 88   ;;  %s2265_s27 = smov 120   ;;  %vm373_vm3 = vcmask 130048  }
  0x10   :  { %v2011_v33 = vpack.c.bf16 %v72_v31, %v71_v30  ;;  %v55_v34 = vld [vmem:[%s2775_s4 + $0x50] sm:$0xff]  ;;  %v56_v35 = vld [vmem:[%s2775_s4 + $0x58] sm:$0xff]  ;;  %v74_v37 = vld [vmem:[%s2775_s4 + $0xe8] sm:$0xff]  ;;  %s2266_s28 = smov 80   ;;  %s2267_s29 = smov 112   ;;  %vm1117_vm4 = vcmask 195584  }
  0x11   :  { %2006 = vmatpush3.bf16.msra.mxu0 %v2005_v26  ;;  %v2013_v38 = vpack.c.bf16 %v56_v35, %v55_v34  ;;  %v2015_v39 = vpack.c.bf16 %v74_v37, %v73_v36  ;;  %v57_v40 = vld [vmem:[%s2775_s4 + $0x60] sm:$0xff]  ;;  %v58_v41 = vld [vmem:[%s2775_s4 + $0x68] sm:$0xff]  ;;  %v75_v42 = vld [vmem:[%s2775_s4 + $0xf0] sm:$0xff]  ;;  %s2268_s14 = smov 64   ;;  %s2270_s15 = smov 56   ;;  %vm1365_vm5 = vcmask 523264  }
  0x12   :  { %2008 = vmatprep.subr.bf16.mxu0 %v2007_v27  ;;  %v76_v43 = vld [vmem:[%s2775_s4 + $0xf8] sm:$0xff]  ;;  %v2017_v44 = vpack.c.bf16 %v58_v41, %v57_v40  ;;  %v59_v46 = vld [vmem:[%s2775_s4 + $0x70] sm:$0xff]  ;;  %v41_v49 = vld [vmem:[%s2771_s0] sm:$0xff]  ;;  %s2273_s16 = smov 40   ;;  %s2274_s17 = smov 8   ;;  %vm1452_vm6 = vcmask 1040384  }
  0x13   :  { %v2019_v45 = vpack.c.bf16 %v76_v43, %v75_v42  ;;  %v60_v47 = vld [vmem:[%s2775_s4 + $0x78] sm:$0xff]  ;;  %v43_v51 = vld [vmem:[%s2771_s0 + $0x10] sm:$0xff]  ;;  %v39_v53 = vld [vmem:[%s2772_s1] sm:$0xff]  ;;  %s2275_s18 = smov 16   ;;  %vm1456_vm7 = vcmask 254976   ;;  %vm2278_vm8 = vmmov 0  }
  0x14   :  { %v2021_v48 = vpack.c.bf16 %v60_v47, %v59_v46  ;;  %v44_v50 = vld [vmem:[%s2771_s0 + $0x18] sm:$0xff]  ;;  %v40_v58 = vld [vmem:[%s2772_s1 + $0x8] sm:$0xff]  ;;  %v196_v10 = vld [vmem:[%s2776_s5] sm:$0xff]  ;;  %s2271_s0 = smov 72   ;;  %s2272_s1 = smov 104  }
  0x15   :  { %2010 = vmatpush3.bf16.msra.mxu0 %v2009_v32  ;;  %v197_v11 = vld [vmem:[%s2776_s5 + $0x8] sm:$0xff]  ;;  %v198_v13 = vld [vmem:[%s2776_s5 + $0x10] sm:$0xff]  ;;  %v199_v14 = vld [vmem:[%s2776_s5 + $0x18] sm:$0xff]  ;;  %s2263_s5 = smov 96  }
  0x16   :  { %2012 = vmatprep.subr.bf16.mxu0 %v2011_v33  ;;  %v2023_v12 = vpack.c.bf16 %v197_v11, %v196_v10  ;;  %v2027_v15 = vpack.c.bf16 %v199_v14, %v198_v13  ;;  %v1673_v23 = vld [vmem:[%s2774_s3] ss:$0 sm:$0xff]  ;;  %v1674_v25 = vld [vmem:[%s2774_s3 + $0x1] ss:$0 sm:$0xff]  ;;  %vm2506_vm2 = vmpackc.low %vm289_vm1, %vm289_vm1 }
  0x17   :  { %v2529_v47 = vld [vmem:[%s2773_s2 + $0x8] sm:$0xff] }
  0x19   :  { %2014 = vmatpush3.bf16.msra.mxu0 %v2013_v38 }
  0x1a   :  { %2016 = vmatprep.subr.bf16.mxu0 %v2015_v39 }
  0x1d   :  { %2018 = vmatpush3.bf16.msra.mxu0 %v2017_v44 }
  0x1e   :  { %2020 = vmatprep.subr.bf16.mxu0 %v2019_v45  ;;  %v2524_v45 = vld [vmem:[%s2773_s2] sm:$0xff]  ;;  %s2269_s2 = smov 48  }
  0x21   :  { %2022 = vmatpush3.bf16.msra.mxu0 %v2021_v48 }
  0x22   :  { %2024 = vmatprep.subr.bf16.mxu0 %v2023_v12 }
  0x24   :  { %142 = vmatmul.mubr.f32.vlgmr.msra.gmra.mrb[0].mxu0 %v41_v49 }
  0x25   :  { %146 = vmatprep.mubr.f32.mxu0 %v44_v50  ;;  %2026 = vmatpush3.bf16.msra.mxu0 %v2023_v12 }
  0x26   :  { %2028 = vmatprep.subr.bf16.mxu0 %v2027_v15 }
  0x28   :  { %147 = vmatmul.mubr.f32.gmra.mrb[2].mxu0 %v43_v51 }
  0x29   :  { %2030 = vmatpush3.bf16.msra.mxu0 %v2027_v15 }
  0xf7   :  { %v1749_v52 = vpop.f32.mrb[0].mxu0 }
  0xf8   :  { %v1750_v54 = vpop.f32.mrb[1].mxu0 }
  0xf9   :  { %v1751_v55 = vadd.f32 %v1750_v54, %v1749_v52 }
  0xfb   :  { %v2452_v56 = vadd.f32 %v1751_v55, %v39_v53  ;;  %v1752_v57 = vpop.f32.mrb[2].mxu0 }
  0xfc   :  { %v1753_v59 = vpop.f32.mrb[3].mxu0 }
  0xfd   :  { %v1754_v60 = vadd.f32 %v1753_v59, %v1752_v57  ;;  %v157_v61 = vsel %vm156_vm0, %v2452_v56, 0.0 }
  0xfe   :  { %158 = vadd.xlane.f32.xlu0 %v157_v61 }
  0xff   :  { %v2459_v62 = vadd.f32 %v1754_v60, %v40_v58 }
 0x101   :  { %v160_v63 = vsel %vm156_vm0, %v2459_v62, 0.0 }
 0x102   :  { %161 = vadd.xlane.f32.xlu0 %v160_v63 }
 0x18b   :  { %v159_v0 = vpop.xlane.xlu0 %158 }
 0x18c   :  { %v164_v1 = vmul.f32 0.03125, %v159_v0 }
 0x18e   :  { %v166_v2 = vsub.f32 %v2452_v56, %v164_v1 }
 0x18f   :  { %v162_v3 = vpop.xlane.xlu0 %161 }
 0x190   :  { %v165_v4 = vmul.f32 0.03125, %v162_v3  ;;  %v168_v5 = vmul.f32 %v166_v2, %v166_v2 }
 0x192   :  { %v167_v6 = vsub.f32 %v2459_v62, %v165_v4  ;;  %v170_v7 = vsel %vm156_vm0, %v168_v5, 0.0 }
 0x193   :  { %171 = vadd.xlane.f32.xlu1 %v170_v7 }
 0x194   :  { %v169_v8 = vmul.f32 %v167_v6, %v167_v6 }
 0x196   :  { %v173_v9 = vsel %vm156_vm0, %v169_v8, 0.0 }
 0x197   :  { %174 = vadd.xlane.f32.xlu1 %v173_v9 }
 0x220   :  { %v172_v16 = vpop.xlane.xlu1 %171 }
 0x221   :  { %v176_v17 = vmul.f32 0.03125, %v172_v16 }
 0x223   :  { %v178_v18 = vadd.f32 1e-05, %v176_v17 }
 0x224   :  { %v175_v19 = vpop.xlane.xlu1 %174 }
 0x225   :  { %2191 = vrsqrt.f32 %v178_v18  ;;  %v177_v20 = vmul.f32 0.03125, %v175_v19 }
 0x227   :  { %v179_v21 = vadd.f32 1e-05, %v177_v20 }
 0x229   :  { %2193 = vrsqrt.f32 %v179_v21 }
 0x22f   :  { %v2192_v22 = vpop.eup %2191 }
 0x230   :  { %v182_v24 = vmul.f32 %v2192_v22, %v166_v2 }
 0x232   :  { %v188_v26 = vmul.f32 %v1673_v23, %v182_v24 }
 0x233   :  { %v2194_v27 = vpop.eup %2193 }
 0x234   :  { %v183_v28 = vmul.f32 %v2194_v27, %v167_v6  ;;  %v194_v29 = vadd.f32 %v1674_v25, %v188_v26 }
 0x236   :  { %v189_v30 = vmul.f32 %v1673_v23, %v183_v28  ;;  %1845 = vmatprep.mubr.msk.f32.mxu0 %vm156_vm0, %v194_v29 }
 0x238   :  { %v195_v31 = vadd.f32 %v1674_v25, %v189_v30 }
 0x23a   :  { %1846 = vmatmul.mubr.msk.f32.vlgmr.msra.gmra.mrb[4].mxu0 %vm156_vm0, %v195_v31 }
 0x30d   :  { %v2487_v32 = vpop.f32.mrb[4].mxu0 }
 0x30e   :  { %v2489_v33 = vpop.f32.mrb[5].mxu0 }
 0x30f   :  { %1852 = vmatprep.mubr.msk.f32.mxu1 %vm289_vm1, %v2489_v33  ;;  %v2495_v34 = vpack.i.bf16 %v2487_v32, %v2489_v33 }
 0x311   :  { %2152 = vrot.lane.b32.xlu0 %v2495_v34, %s2263_s5 }
 0x315   :  { %2162 = vrot.lane.b32.xlu0 %v2495_v34, %s2264_s26  ;;  %s2276_s26 = smov 24  }
 0x319   :  { %485 = vrot.lane.b32.xlu0 %v2489_v33, %s2265_s27 }
 0x31d   :  { %2167 = vrot.lane.b32.xlu0 %v2495_v34, %s2266_s28 }
 0x321   :  { %687 = vrot.lane.b32.xlu0 %v2489_v33, %s2267_s29 }
 0x383   :  { %v2153_v35 = vpop.permute.xlu0 %2152 }
 0x384   :  { %v2155_v36 = vunpack.i.h.bf16 %v2153_v35  ;;  %v2154_v37 = vunpack.i.l.bf16 %v2153_v35 }
 0x386   :  { %v2031_v39 = vpack.c.bf16 %v2155_v36, %v2154_v37 }
 0x387   :  { %v2163_v40 = vpop.permute.xlu0 %2162 }
 0x388   :  { %v2165_v41 = vunpack.i.h.bf16 %v2163_v40  ;;  %v2164_v42 = vunpack.i.l.bf16 %v2163_v40  ;;  %2033 = vmatprep.subr.msk.bf16.mxu1 %vm2506_vm2, %v2031_v39 }
 0x389   :  { %2036 = vmatpush3.bf16.xpose.msk.msra.mxu1 %vm2506_vm2, %v2031_v39 }
 0x38a   :  { %v2041_v43 = vpack.c.bf16 %v2165_v41, %v2164_v42 }
 0x38b   :  { %v486_v44 = vpop.permute.xlu0 %485 }
 0x38c   :  { %2043 = vmatprep.subr.msk.bf16.mxu1 %vm2506_vm2, %v2041_v43 }
 0x38f   :  { %v2168_v57 = vpop.permute.xlu0 %2167 }
 0x390   :  { %1853 = vmatmul.mubr.msk.f32.vlgmr.msra.gmra.mrb[0].mxu1 %vm289_vm1, %v2487_v32  ;;  %v2170_v61 = vunpack.i.h.bf16 %v2168_v57  ;;  %v2169_v0 = vunpack.i.l.bf16 %v2168_v57 }
 0x391   :  { %2046 = vmatpush3.bf16.xpose.msk.msra.mxu1 %vm2506_vm2, %v2041_v43  ;;  %1866 = vmatprep.mubr.msk.f32.mxu1 %vm289_vm1, %v486_v44 }
 0x392   :  { %v2051_v5 = vpack.c.bf16 %v2170_v61, %v2169_v0 }
 0x393   :  { %v688_v16 = vpop.permute.xlu0 %687 }
 0x463   :  { %v1854_v46 = vpop.f32.mrb[0].mxu1 }
 0x464   :  { %v364_v48 = vpop.f32.mrb[1].mxu1  ;;  %v370_v50 = vadd.f32 %v1854_v46, %v2529_v47 }
 0x465   :  { %v365_v49 = vadd.f32 %v364_v48, %v2524_v45 }
 0x466   :  { %v377_v52 = vsel %vm373_vm3, %v370_v50, -inf }
 0x467   :  { %v374_v51 = vsel %vm373_vm3, %v365_v49, -inf }
 0x468   :  { %375 = vmax.xlane.f32.xlu1 %v374_v51 }
 0x46c   :  { %378 = vmax.xlane.f32.xlu1 %v377_v52 }
 0x47d   :  { %2157 = vrot.lane.b32.xlu1 %v2495_v34, %s2268_s14 }
 0x481   :  { %487 = vrot.lane.b32.xlu1 %v2487_v32, %s2265_s27 }
 0x4f5   :  { %v376_v53 = vpop.xlane.xlu1 %375 }
 0x4f6   :  { %v380_v54 = vsub.f32 %v365_v49, %v376_v53 }
 0x4f8   :  { %v382_v59 = vmul.f32 1.442695, %v380_v54 }
 0x4f9   :  { %v379_v55 = vpop.xlane.xlu1 %378 }
 0x4fa   :  { %v381_v58 = vsub.f32 %v370_v50, %v379_v55 }
 0x4fc   :  { %v384_v60 = vmul.f32 1.442695, %v381_v58 }
 0x4fd   :  { %v2158_v63 = vpop.permute.xlu1 %2157 }
 0x4fe   :  { %2195 = vpow2.f32 %v384_v60  ;;  %v2160_v1 = vunpack.i.h.bf16 %v2158_v63  ;;  %v2159_v2 = vunpack.i.l.bf16 %v2158_v63 }
 0x4ff   :  { %2197 = vpow2.f32 %v382_v59 }
 0x500   :  { %v2037_v3 = vpack.c.bf16 %v2160_v1, %v2159_v2 }
 0x501   :  { %v488_v4 = vpop.permute.xlu1 %487 }
 0x502   :  { %2038 = vmatprep.subr.bf16.mxu0 %v2037_v3  ;;  %1867 = vmatmul.mubr.msk.f32.vlgmr.msra.gmra.mrb[2].mxu1 %vm289_vm1, %v488_v4 }
 0x503   :  { %2040 = vmatpush3.bf16.msra.mxu0 %v2037_v3 }
 0x504   :  { %2053 = vmatprep.subr.msk.bf16.mxu0 %vm2506_vm2, %v2051_v5 }
 0x508   :  { %v2196_v6 = vpop.eup %2195 }
 0x509   :  { %v389_v7 = vsel %vm373_vm3, %v2196_v6, 0.0  ;;  %v2198_v8 = vpop.eup %2197 }
 0x50a   :  { %390 = vadd.xlane.f32.xlu1 %v389_v7  ;;  %v386_v9 = vsel %vm373_vm3, %v2198_v8, 0.0 }
 0x50e   :  { %387 = vadd.xlane.f32.xlu1 %v386_v9 }
 0x51f   :  { %689 = vrot.lane.b32.xlu1 %v2487_v32, %s2267_s29 }
 0x597   :  { %v391_v10 = vpop.xlane.xlu1 %390 }
 0x598   :  { %2199 = vrcp.f32 %v391_v10 }
 0x59b   :  { %v388_v11 = vpop.xlane.xlu1 %387 }
 0x59c   :  { %2201 = vrcp.f32 %v388_v11 }
 0x59f   :  { %v690_v17 = vpop.permute.xlu1 %689 }
 0x5a2   :  { %v2200_v12 = vpop.eup %2199 }
 0x5a3   :  { %v395_v15 = vmul.f32 %v2200_v12, %v2196_v6 }
 0x5a6   :  { %v2202_v13 = vpop.eup %2201 }
 0x5a7   :  { %v394_v14 = vmul.f32 %v2202_v13, %v2198_v8 }
 0x5a9   :  { %1859 = vmatprep.mubr.msk.f32.mxu0 %vm373_vm3, %v394_v14 }
 0x5aa   :  { %1860 = vmatmul.mubr.msk.f32.vlgmr.msra.gmra.mrb[6].mxu0 %vm373_vm3, %v395_v15 }
 0x5ab   :  { %2056 = vmatpush3.bf16.xpose.msk.msra.mxu0 %vm2506_vm2, %v2051_v5  ;;  %1880 = vmatprep.mubr.msk.f32.mxu0 %vm289_vm1, %v688_v16 }
 0x5b2   :  { %1881 = vmatmul.mubr.msk.f32.vlgmr.msra.gmra.mrb[8].mxu0 %vm289_vm1, %v690_v17 }
 0x5d5   :  { %v1868_v18 = vpop.f32.mrb[2].mxu1 }
 0x5d6   :  { %v573_v19 = vadd.f32 %v1868_v18, %v2529_v47  ;;  %v567_v20 = vpop.f32.mrb[3].mxu1 }
 0x5d7   :  { %v568_v21 = vadd.f32 %v567_v20, %v2524_v45 }
 0x5d8   :  { %v579_v22 = vsel %vm373_vm3, %v573_v19, -inf }
 0x5d9   :  { %580 = vmax.xlane.f32.xlu1 %v579_v22  ;;  %v576_v23 = vsel %vm373_vm3, %v568_v21, -inf }
 0x5da   :  { %577 = vmax.xlane.f32.xlu0 %v576_v23 }
 0x666   :  { %v581_v24 = vpop.xlane.xlu1 %580 }
 0x667   :  { %v583_v25 = vsub.f32 %v573_v19, %v581_v24  ;;  %v578_v29 = vpop.xlane.xlu0 %577 }
 0x668   :  { %v582_v30 = vsub.f32 %v568_v21, %v578_v29 }
 0x669   :  { %v586_v26 = vmul.f32 1.442695, %v583_v25 }
 0x66a   :  { %v584_v36 = vmul.f32 1.442695, %v582_v30 }
 0x66b   :  { %2203 = vpow2.f32 %v586_v26 }
 0x66c   :  { %2205 = vpow2.f32 %v584_v36 }
 0x675   :  { %v2555_v27 = vpop.eup %2203 }
 0x676   :  { %v591_v28 = vsel %vm373_vm3, %v2555_v27, 0.0  ;;  %v2206_v44 = vpop.eup %2205 }
 0x677   :  { %592 = vadd.xlane.f32.xlu1 %v591_v28  ;;  %v588_v46 = vsel %vm373_vm3, %v2206_v44, 0.0 }
 0x67d   :  { %v2559_v31 = vpop.f32.mrb[6].mxu0 }
 0x67e   :  { %v2561_v35 = vpop.f32.mrb[7].mxu0 }
 0x685   :  { %v1882_v37 = vpop.f32.mrb[8].mxu0 }
 0x686   :  { %v769_v39 = vpop.f32.mrb[9].mxu0  ;;  %v775_v41 = vadd.f32 %v1882_v37, %v2529_v47 }
 0x687   :  { %v770_v40 = vadd.f32 %v769_v39, %v2524_v45 }
 0x688   :  { %v781_v43 = vsel %vm373_vm3, %v775_v41, -inf }
 0x689   :  { %v778_v42 = vsel %vm373_vm3, %v770_v40, -inf }
 0x68a   :  { %779 = vmax.xlane.f32.xlu0 %v778_v42 }
 0x68e   :  { %782 = vmax.xlane.f32.xlu0 %v781_v43 }
 0x692   :  { %589 = vadd.xlane.f32.xlu0 %v588_v46 }
 0x704   :  { %v593_v63 = vpop.xlane.xlu1 %592 }
 0x717   :  { %v780_v48 = vpop.xlane.xlu0 %779 }
 0x718   :  { %v784_v49 = vsub.f32 %v770_v40, %v780_v48 }
 0x71a   :  { %v786_v50 = vmul.f32 1.442695, %v784_v49 }
 0x71b   :  { %v783_v51 = vpop.xlane.xlu0 %782 }
 0x71c   :  { %2207 = vpow2.f32 %v786_v50  ;;  %v785_v52 = vsub.f32 %v775_v41, %v783_v51 }
 0x71e   :  { %v788_v53 = vmul.f32 1.442695, %v785_v52 }
 0x71f   :  { %v590_v54 = vpop.xlane.xlu0 %589 }
 0x720   :  { %2209 = vpow2.f32 %v788_v53 }
 0x721   :  { %2211 = vrcp.f32 %v590_v54  ;;  %v1120_v54 = vld [vmem:[%s2777_s6] sm:$0xff] }
 0x722   :  { %2213 = vrcp.f32 %v593_v63 }
 0x726   :  { %v2208_v55 = vpop.eup %2207 }
 0x727   :  { %v790_v57 = vsel %vm373_vm3, %v2208_v55, 0.0 }
 0x728   :  { %791 = vadd.xlane.f32.xlu0 %v790_v57  ;;  %v1122_v57 = vld [vmem:[%s2777_s6 + $0x10] sm:$0xff] }
 0x72a   :  { %v2210_v58 = vpop.eup %2209 }
 0x72b   :  { %v2212_v59 = vpop.eup %2211  ;;  %v793_v60 = vsel %vm373_vm3, %v2210_v58, 0.0 }
 0x72c   :  { %794 = vadd.xlane.f32.xlu1 %v793_v60  ;;  %v596_v61 = vmul.f32 %v2212_v59, %v2206_v44  ;;  %v2214_v6 = vpop.eup %2213  ;;  %v1123_v59 = vld [vmem:[%s2777_s6 + $0x18] sm:$0xff] }
 0x72d   :  { %v2075_v60 = vpack.c.bf16 %v1123_v59, %v1122_v57  ;;  %v1357_v59 = vld [vmem:[%s2779_s8 + $0x28] sm:$0xff] }
 0x72e   :  { %1873 = vmatprep.mubr.msk.f32.mxu1 %vm373_vm3, %v596_v61 }
 0x73d   :  { %2177 = vrot.lane.b32.xlu1 %v2495_v34, %s2269_s2 }
 0x73e   :  { %2172 = vrot.lane.b32.xlu0 %v2495_v34, %s2270_s15 }
 0x741   :  { %2182 = vrot.lane.b32.xlu1 %v2495_v34, %s2271_s0 }
 0x742   :  { %891 = vrot.lane.b32.xlu0 %v2487_v32, %s2272_s1  ;;  %v597_v32 = vmul.f32 %v2214_v6, %v2555_v27 }
 0x745   :  { %889 = vrot.lane.b32.xlu1 %v2489_v33, %s2272_s1 }
 0x7b5   :  { %v792_v0 = vpop.xlane.xlu0 %791 }
 0x7b6   :  { %2215 = vrcp.f32 %v792_v0 }
 0x7b9   :  { %v795_v1 = vpop.xlane.xlu1 %794  ;;  %v2173_v2 = vpop.permute.xlu0 %2172 }
 0x7ba   :  { %2217 = vrcp.f32 %v795_v1  ;;  %v2175_v3 = vunpack.i.h.bf16 %v2173_v2  ;;  %v2174_v4 = vunpack.i.l.bf16 %v2173_v2 }
 0x7bc   :  { %v2047_v5 = vpack.c.bf16 %v2175_v3, %v2174_v4 }
 0x7bd   :  { %v2178_v7 = vpop.permute.xlu1 %2177  ;;  %v892_v19 = vpop.permute.xlu0 %891 }
 0x7be   :  { %v2180_v8 = vunpack.i.h.bf16 %v2178_v7  ;;  %v2179_v9 = vunpack.i.l.bf16 %v2178_v7  ;;  %2048 = vmatprep.subr.bf16.mxu1 %v2047_v5 }
 0x7bf   :  { %2050 = vmatpush3.bf16.msra.mxu1 %v2047_v5 }
 0x7c0   :  { %v2216_v10 = vpop.eup %2215  ;;  %v2057_v33 = vpack.c.bf16 %v2180_v8, %v2179_v9 }
 0x7c1   :  { %v2183_v11 = vpop.permute.xlu1 %2182  ;;  %v798_v12 = vmul.f32 %v2216_v10, %v2208_v55  ;;  %v1121_v55 = vld [vmem:[%s2777_s6 + $0x8] sm:$0xff] }
 0x7c2   :  { %v2185_v13 = vunpack.i.h.bf16 %v2183_v11  ;;  %v2184_v14 = vunpack.i.l.bf16 %v2183_v11  ;;  %1874 = vmatmul.mubr.msk.f32.vlgmr.msra.gmra.mrb[4].mxu1 %vm373_vm3, %v597_v32  ;;  %2058 = vmatprep.subr.bf16.mxu1 %v2057_v33 }
 0x7c3   :  { %2060 = vmatpush3.bf16.msra.mxu1 %v2057_v33  ;;  %1887 = vmatprep.mubr.msk.f32.mxu1 %vm373_vm3, %v798_v12 }
 0x7c4   :  { %v2218_v15 = vpop.eup %2217  ;;  %v2061_v16 = vpack.c.bf16 %v2185_v13, %v2184_v14 }
 0x7c5   :  { %v799_v17 = vmul.f32 %v2218_v15, %v2210_v58  ;;  %v890_v18 = vpop.permute.xlu1 %889  ;;  %v2071_v58 = vpack.c.bf16 %v1121_v55, %v1120_v54  ;;  %v1354_v54 = vld [vmem:[%s2779_s8 + $0x10] sm:$0xff]  ;;  %v1355_v55 = vld [vmem:[%s2779_s8 + $0x18] sm:$0xff] }
 0x7c6   :  { %2063 = vmatprep.subr.msk.bf16.mxu1 %vm2506_vm2, %v2061_v16  ;;  %v2091_v57 = vpack.c.bf16 %v1355_v55, %v1354_v54  ;;  %v1573_v55 = vld [vmem:[%s2781_s10 + $0x30] sm:$0xff] }
 0x7c7   :  { %1888 = vmatmul.mubr.msk.f32.vlgmr.msra.gmra.mrb[6].mxu1 %vm373_vm3, %v799_v17 }
 0x7c8   :  { %1894 = vmatprep.mubr.msk.f32.mxu1 %vm289_vm1, %v890_v18 }
 0x7cc   :  { %2066 = vmatpush3.bf16.xpose.msk.msra.mxu1 %vm2506_vm2, %v2061_v16 }
 0x7d3   :  { %1895 = vmatmul.mubr.msk.f32.vlgmr.msra.gmra.mrb[8].mxu1 %vm289_vm1, %v892_v19 }
 0x895   :  { %v1875_v20 = vpop.f32.mrb[4].mxu1 }
 0x896   :  { %v676_v21 = vpop.f32.mrb[5].mxu1 }
 0x89a   :  { %v1889_v22 = vpop.f32.mrb[6].mxu1 }
 0x89b   :  { %v878_v23 = vpop.f32.mrb[7].mxu1 }
 0x8a6   :  { %v1896_v24 = vpop.f32.mrb[8].mxu1 }
 0x8a7   :  { %v977_v25 = vadd.f32 %v1896_v24, %v2529_v47  ;;  %v971_v26 = vpop.f32.mrb[9].mxu1 }
 0x8a8   :  { %v972_v27 = vadd.f32 %v971_v26, %v2524_v45  ;;  %v1253_v26 = vld [vmem:[%s2778_s7 + $0x8] sm:$0xff] }
 0x8a9   :  { %v983_v28 = vsel %vm373_vm3, %v977_v25, -inf }
 0x8aa   :  { %984 = vmax.xlane.f32.xlu0 %v983_v28  ;;  %v980_v29 = vsel %vm373_vm3, %v972_v27, -inf  ;;  %v1254_v28 = vld [vmem:[%s2778_s7 + $0x10] sm:$0xff] }
 0x8ab   :  { %981 = vmax.xlane.f32.xlu1 %v980_v29  ;;  %v1255_v29 = vld [vmem:[%s2778_s7 + $0x18] sm:$0xff] }
 0x8bc   :  { %2187 = vrot.lane.b32.xlu1 %v2495_v34, %s2273_s16 }
 0x8c0   :  { %1093 = vrot.lane.b32.xlu1 %v1875_v20, %s2274_s17 }
 0x8c4   :  { %1099 = vrot.lane.b32.xlu1 %v878_v23, %s2275_s18 }
 0x8c8   :  { %1101 = vrot.lane.b32.xlu1 %v1889_v22, %s2275_s18 }
 0x937   :  { %v985_v38 = vpop.xlane.xlu0 %984 }
 0x938   :  { %v987_v30 = vsub.f32 %v977_v25, %v985_v38  ;;  %v982_v47 = vpop.xlane.xlu1 %981  ;;  %v1252_v25 = vld [vmem:[%s2778_s7] sm:$0xff]  ;;  %v2083_v38 = vpack.c.bf16 %v1255_v29, %v1254_v28  ;;  %v2277_v28 = vmov 0.0|0.0   ;;  %v1482_v29 = vld [vmem:[%s2780_s9 + $0x10] sm:$0xff] }
 0x939   :  { %v986_v36 = vsub.f32 %v972_v27, %v982_v47  ;;  %v2079_v27 = vpack.c.bf16 %v1253_v26, %v1252_v25 }
 0x93a   :  { %v990_v37 = vmul.f32 1.442695, %v987_v30 }
 0x93b   :  { %v988_v45 = vmul.f32 1.442695, %v986_v36  ;;  %2080 = vmatprep.subr.bf16.mxu1 %v2079_v27 }
 0x93c   :  { %v2188_v39 = vpop.permute.xlu1 %2187  ;;  %2082 = vmatpush3.bf16.msra.mxu1 %v2079_v27  ;;  %v1480_v27 = vld [vmem:[%s2780_s9] sm:$0xff] }
 0x93d   :  { %2219 = vpow2.f32 %v988_v45  ;;  %v2190_v40 = vunpack.i.h.bf16 %v2188_v39  ;;  %v2189_v41 = vunpack.i.l.bf16 %v2188_v39  ;;  %2084 = vmatprep.subr.bf16.mxu1 %v2083_v38 }
 0x93e   :  { %2221 = vpow2.f32 %v990_v37 }
 0x93f   :  { %v2067_v42 = vpack.c.bf16 %v2190_v40, %v2189_v41  ;;  %v1704_v41 = vld [vmem:[%s2774_s3 + $0x3] ss:$0 sm:$0xff] }
 0x940   :  { %v1094_v0 = vpop.permute.xlu1 %1093  ;;  %2086 = vmatpush3.bf16.msra.mxu1 %v2083_v38  ;;  %v1483_v38 = vld [vmem:[%s2780_s9 + $0x18] sm:$0xff] }
 0x941   :  { %2068 = vmatprep.subr.bf16.mxu0 %v2067_v42  ;;  %v1114_v6 = vsel %vm289_vm1, %v2559_v31, %v1094_v0  ;;  %2103 = vmatprep.subr.bf16.mxu1 %v2277_v28 }
 0x942   :  { %2070 = vmatpush3.bf16.msra.mxu0 %v2067_v42 }
 0x943   :  { %2072 = vmatprep.subr.bf16.mxu0 %v2071_v58 }
 0x944   :  { %v1100_v1 = vpop.permute.xlu1 %1099 }
 0x947   :  { %v2220_v34 = vpop.eup %2219 }
 0x948   :  { %v992_v43 = vsel %vm373_vm3, %v2220_v34, 0.0  ;;  %v2222_v44 = vpop.eup %2221  ;;  %v1102_v3 = vpop.permute.xlu1 %1101 }
 0x949   :  { %993 = vadd.xlane.f32.xlu0 %v992_v43  ;;  %v995_v46 = vsel %vm373_vm3, %v2222_v44, 0.0  ;;  %v1116_v9 = vsel %vm373_vm3, %v1114_v6, %v1102_v3 }
 0x94d   :  { %996 = vadd.xlane.f32.xlu0 %v995_v46 }
 0x963   :  { %1091 = vrot.lane.b32.xlu0 %v676_v21, %s2274_s17 }
 0x9d6   :  { %v994_v48 = vpop.xlane.xlu0 %993 }
 0x9d7   :  { %2223 = vrcp.f32 %v994_v48 }
 0x9da   :  { %v997_v49 = vpop.xlane.xlu0 %996 }
 0x9db   :  { %2225 = vrcp.f32 %v997_v49 }
 0x9de   :  { %v1092_v2 = vpop.permute.xlu0 %1091 }
 0x9df   :  { %v1113_v4 = vsel %vm289_vm1, %v2561_v35, %v1092_v2  ;;  %v1701_v35 = vld [vmem:[%s2774_s3 + $0x2] ss:$0 sm:$0xff] }
 0x9e0   :  { %v1115_v7 = vsel %vm373_vm3, %v1113_v4, %v1100_v1  ;;  %v1706_v1 = vld [vmem:[%s2774_s3 + $0x5] ss:$0 sm:$0xff] }
 0x9e1   :  { %v2224_v50 = vpop.eup %2223 }
 0x9e2   :  { %v1000_v51 = vmul.f32 %v2224_v50, %v2220_v34  ;;  %v1705_v34 = vld [vmem:[%s2774_s3 + $0x4] ss:$0 sm:$0xff] }
 0x9e4   :  { %1901 = vmatprep.mubr.msk.f32.mxu0 %vm373_vm3, %v1000_v51  ;;  %v1352_v51 = vld [vmem:[%s2779_s8] sm:$0xff] }
 0x9e5   :  { %v2226_v52 = vpop.eup %2225 }
 0x9e6   :  { %v1001_v53 = vmul.f32 %v2226_v52, %v2222_v44  ;;  %v1353_v52 = vld [vmem:[%s2779_s8 + $0x8] sm:$0xff] }
 0x9e8   :  { %1902 = vmatmul.mubr.msk.f32.vlgmr.msra.gmra.mrb[10].mxu0 %vm373_vm3, %v1001_v53  ;;  %v2087_v53 = vpack.c.bf16 %v1353_v52, %v1352_v51  ;;  %v1571_v52 = vld [vmem:[%s2781_s10 + $0x20] sm:$0xff] }
 0x9e9   :  { %2074 = vmatpush3.bf16.msra.mxu0 %v2071_v58  ;;  %v1356_v58 = vld [vmem:[%s2779_s8 + $0x20] sm:$0xff] }
 0x9ea   :  { %2076 = vmatprep.subr.bf16.mxu0 %v2075_v60 }
 0x9ed   :  { %2078 = vmatpush3.bf16.msra.mxu0 %v2075_v60  ;;  %v2095_v60 = vpack.c.bf16 %v1357_v59, %v1356_v58  ;;  %v1575_v59 = vld [vmem:[%s2781_s10 + $0x40] sm:$0xff] }
 0x9ee   :  { %2088 = vmatprep.subr.bf16.mxu0 %v2087_v53 }
 0xabb   :  { %v1903_v61 = vpop.f32.mrb[10].mxu0 }
 0xabc   :  { %1109 = vrot.lane.b32.xlu1 %v1903_v61, %s2276_s26  ;;  %v1080_v63 = vpop.f32.mrb[11].mxu0  ;;  %v1358_v61 = vld [vmem:[%s2779_s8 + $0x30] sm:$0xff] }
 0xabd   :  { %1107 = vrot.lane.b32.xlu0 %v1080_v63, %s2276_s26  ;;  %v1359_v63 = vld [vmem:[%s2779_s8 + $0x38] sm:$0xff] }
 0xabe   :  { %v2099_v0 = vpack.c.bf16 %v1359_v63, %v1358_v61  ;;  %v1577_v63 = vld [vmem:[%s2781_s10 + $0x50] sm:$0xff] }
 0xb2e   :  { %v1110_v5 = vpop.permute.xlu1 %1109 }
 0xb2f   :  { %v1108_v8 = vpop.permute.xlu0 %1107  ;;  %v1119_v32 = vsel %vm1117_vm4, %v1116_v9, %v1110_v5 }
 0xb30   :  { %v1118_v10 = vsel %vm1117_vm4, %v1115_v7, %v1108_v8 }
 0xb31   :  { %1912 = vmatprep.mubr.msk.f32.mxu0 %vm156_vm0, %v1118_v10 }
 0xb32   :  { %1913 = vmatmul.mubr.msk.f32.vlgmr.msra.gmra.mrb[12].mxu0 %vm156_vm0, %v1119_v32 }
 0xb33   :  { %2090 = vmatpush3.bf16.msra.mxu0 %v2087_v53  ;;  %v1572_v53 = vld [vmem:[%s2781_s10 + $0x28] sm:$0xff] }
 0xb34   :  { %2092 = vmatprep.subr.bf16.mxu0 %v2091_v57  ;;  %v2116_v54 = vpack.c.bf16 %v1572_v53, %v1571_v52 }
 0xb37   :  { %2094 = vmatpush3.bf16.msra.mxu0 %v2091_v57  ;;  %v1574_v57 = vld [vmem:[%s2781_s10 + $0x38] sm:$0xff] }
 0xb38   :  { %2096 = vmatprep.subr.bf16.mxu0 %v2095_v60  ;;  %v2119_v58 = vpack.c.bf16 %v1574_v57, %v1573_v55 }
 0xb3b   :  { %2098 = vmatpush3.bf16.msra.mxu0 %v2095_v60  ;;  %v1576_v60 = vld [vmem:[%s2781_s10 + $0x48] sm:$0xff] }
 0xb3c   :  { %2100 = vmatprep.subr.bf16.mxu0 %v2099_v0  ;;  %v2122_v61 = vpack.c.bf16 %v1576_v60, %v1575_v59 }
 0xb3f   :  { %2102 = vmatpush3.bf16.msra.mxu0 %v2099_v0  ;;  %v1578_v0 = vld [vmem:[%s2781_s10 + $0x58] sm:$0xff] }
 0xc05   :  { %v1914_v33 = vpop.f32.mrb[12].mxu0 }
 0xc06   :  { %v1207_v11 = vadd.f32 %v1914_v33, %v1701_v35  ;;  %v1201_v12 = vpop.f32.mrb[13].mxu0 }
 0xc07   :  { %v1202_v13 = vadd.f32 %v1701_v35, %v1201_v12 }
 0xc08   :  { %v2619_v31 = vadd.f32 %v1207_v11, %v2459_v62 }
 0xc09   :  { %v2622_v14 = vadd.f32 %v1202_v13, %v2452_v56  ;;  %v1709_v13 = vld [vmem:[%s2774_s3 + $0x6] ss:$0 sm:$0xff] }
 0xc0a   :  { %v1217_v15 = vsel %vm156_vm0, %v2619_v31, 0.0 }
 0xc0b   :  { %1218 = vadd.xlane.f32.xlu1 %v1217_v15  ;;  %v1214_v16 = vsel %vm156_vm0, %v2622_v14, 0.0 }
 0xc0c   :  { %1215 = vadd.xlane.f32.xlu0 %v1214_v16 }
 0xc98   :  { %v1219_v17 = vpop.xlane.xlu1 %1218 }
 0xc99   :  { %v1221_v18 = vmul.f32 0.03125, %v1219_v17  ;;  %v1216_v19 = vpop.xlane.xlu0 %1215 }
 0xc9a   :  { %v1220_v20 = vmul.f32 0.03125, %v1216_v19 }
 0xc9b   :  { %v1223_v21 = vsub.f32 %v2619_v31, %v1221_v18 }
 0xc9c   :  { %v1222_v62 = vsub.f32 %v2622_v14, %v1220_v20 }
 0xc9d   :  { %v1225_v23 = vmul.f32 %v1223_v21, %v1223_v21 }
 0xc9e   :  { %v1224_v22 = vmul.f32 %v1222_v62, %v1222_v62 }
 0xc9f   :  { %v1229_v24 = vsel %vm156_vm0, %v1225_v23, 0.0 }
 0xca0   :  { %v1226_v56 = vsel %vm156_vm0, %v1224_v22, 0.0 }
 0xca1   :  { %1227 = vadd.xlane.f32.xlu0 %v1226_v56 }
 0xca5   :  { %1230 = vadd.xlane.f32.xlu0 %v1229_v24 }
 0xd2e   :  { %v1228_v30 = vpop.xlane.xlu0 %1227 }
 0xd2f   :  { %v1232_v47 = vmul.f32 0.03125, %v1228_v30  ;;  %v2107_v30 = vpack.c.bf16 %v1483_v38, %v1482_v29 }
 0xd31   :  { %v1234_v36 = vadd.f32 1e-05, %v1232_v47  ;;  %v2279_v47 = vmov 0.0  }
 0xd32   :  { %v1231_v37 = vpop.xlane.xlu0 %1230 }
 0xd33   :  { %2227 = vrsqrt.f32 %v1234_v36  ;;  %v1233_v45 = vmul.f32 0.03125, %v1231_v37 }
 0xd35   :  { %v1235_v39 = vadd.f32 1e-05, %v1233_v45 }
 0xd37   :  { %2229 = vrsqrt.f32 %v1235_v39 }
 0xd3d   :  { %v2228_v40 = vpop.eup %2227 }
 0xd3e   :  { %v1238_v42 = vmul.f32 %v2228_v40, %v1222_v62  ;;  %v1712_v40 = vld [vmem:[%s2774_s3 + $0x7] ss:$0 sm:$0xff] }
 0xd40   :  { %v1244_v43 = vmul.f32 %v1704_v41, %v1238_v42  ;;  %v1567_v42 = vld [vmem:[%s2781_s10] sm:$0xff] }
 0xd41   :  { %v2230_v44 = vpop.eup %2229 }
 0xd42   :  { %v1239_v46 = vmul.f32 %v2230_v44, %v1223_v21  ;;  %v1250_v48 = vadd.f32 %v1705_v34, %v1244_v43  ;;  %v1713_v43 = vld [vmem:[%s2774_s3 + $0x8] ss:$0 sm:$0xff] }
 0xd44   :  { %v1245_v49 = vmul.f32 %v1704_v41, %v1239_v46  ;;  %1923 = vmatprep.mubr.msk.f32.mxu1 %vm156_vm0, %v1250_v48 }
 0xd46   :  { %v1251_v50 = vadd.f32 %v1705_v34, %v1245_v49  ;;  %v1568_v34 = vld [vmem:[%s2781_s10 + $0x8] sm:$0xff]  ;;  %v1569_v49 = vld [vmem:[%s2781_s10 + $0x10] sm:$0xff] }
 0xd47   :  { %v2110_v46 = vpack.c.bf16 %v1568_v34, %v1567_v42 }
 0xd48   :  { %1924 = vmatmul.mubr.msk.f32.vlgmr.msra.gmra.mrb[10].mxu1 %vm156_vm0, %v1251_v50  ;;  %v1570_v50 = vld [vmem:[%s2781_s10 + $0x18] sm:$0xff] }
 0xd49   :  { %1953 = vmatprep.mubr.msk.f32.mxu1 %vm2278_vm8, %v2279_v47  ;;  %v2113_v51 = vpack.c.bf16 %v1570_v50, %v1569_v49 }
 0xe1b   :  { %v1925_v2 = vpop.f32.mrb[10].mxu1 }
 0xe1c   :  { %v1339_v3 = vadd.f32 %v1925_v2, %v1706_v1  ;;  %v1333_v4 = vpop.f32.mrb[11].mxu1  ;;  %v1579_v2 = vld [vmem:[%s2781_s10 + $0x60] sm:$0xff] }
 0xe1d   :  { %v1334_v5 = vadd.f32 %v1706_v1, %v1333_v4  ;;  %v2125_v1 = vpack.c.bf16 %v1578_v0, %v1577_v63 }
 0xe1e   :  { %v1345_v6 = vmul.f32 0.70710677, %v1339_v3  ;;  %v1343_v33 = vmul.f32 0.5, %v1339_v3  ;;  %v1580_v3 = vld [vmem:[%s2781_s10 + $0x68] sm:$0xff] }
 0xe1f   :  { %v1344_v7 = vmul.f32 0.70710677, %v1334_v5  ;;  %v1342_v32 = vmul.f32 0.5, %v1334_v5  ;;  %v2128_v4 = vpack.c.bf16 %v1580_v3, %v1579_v2  ;;  %v1581_v5 = vld [vmem:[%s2781_s10 + $0x70] sm:$0xff] }
 0xe20   :  { %2231 = verf.f32 %v1345_v6  ;;  %v1582_v6 = vld [vmem:[%s2781_s10 + $0x78] sm:$0xff]  ;;  %s2280_s10 = smov [#allocation2]  }
 0xe21   :  { %2233 = verf.f32 %v1344_v7  ;;  %v2131_v7 = vpack.c.bf16 %v1582_v6, %v1581_v5  ;;  %s1665_s6 = sshll.u32 %s2280_s10, 4  ;;  %s1666_s6 = int_to_ptr.vmem [resolvable:$true] %s1665_s6 }
 0xe22   :  { %s2239_s27 = scalar_lea.vmem %s1666_s6, 32  ;;  %p2244_p1 = scmp.lt.s32.totalorder %s1666_s6, %s1666_s6 }
 0xe23   :  { %p2240_p0 = scmp.ne.s32.totalorder %s1666_s6, %s2239_s27  ;;  %p2245_p2 = scmp.lt.s32.totalorder %s2239_s27, %s2239_s27 }
 0xe25   :  { %p2246_p3 = por %p2245_p2, %p2244_p1 }
 0xe27   :  { %p2247_p4 = pnand %p2246_p3, %p2240_p0 }
 0xe2a   :  { %v2232_v8 = vpop.eup %2231 }
 0xe2b   :  { %v2234_v9 = vpop.eup %2233  ;;  %v1349_v10 = vadd.f32 1.0, %v2232_v8  ;;  %v1714_v8 = vld [vmem:[%s2774_s3 + $0x9] ss:$0 sm:$0xff] }
 0xe2c   :  { %v1348_v35 = vadd.f32 1.0, %v2234_v9 }
 0xe2d   :  { %v1351_v12 = vmul.f32 %v1349_v10, %v1343_v33 }
 0xe2e   :  { %v1350_v11 = vmul.f32 %v1348_v35, %v1342_v32 }
 0xe30   :  { %1942 = vmatprep.mubr.msk.f32.mxu0 %vm1365_vm5, %v1350_v11 }
 0xe31   :  { %1943 = vmatmul.mubr.msk.f32.vlgmr.msra.gmra.mrb[14].mxu0 %vm1365_vm5, %v1351_v12 }
 0xf04   :  { %v1944_v15 = vpop.f32.mrb[14].mxu0 }
 0xf05   :  { %v1444_v16 = vadd.f32 %v1944_v15, %v1709_v13  ;;  %v1438_v17 = vpop.f32.mrb[15].mxu0  ;;  %v1716_v15 = vld [vmem:[%s2774_s3 + $0xa] ss:$0 sm:$0xff] }
 0xf06   :  { %v1439_v18 = vadd.f32 %v1709_v13, %v1438_v17 }
 0xf07   :  { %v1448_v19 = vadd.f32 %v1444_v16, %v2619_v31  ;;  %v1481_v31 = vld [vmem:[%s2780_s9 + $0x8] sm:$0xff] }
 0xf08   :  { %v1447_v20 = vadd.f32 %v1439_v18, %v2622_v14  ;;  %v2104_v14 = vpack.c.bf16 %v1481_v31, %v1480_v27 }
 0xf09   :  { %v1450_v21 = vrot.slane %v1448_v19, 7 }
 0xf0a   :  { %2105 = vmatpush3.bf16.msra.mxu1 %v2104_v14 }
 0xf0b   :  { %v1453_v62 = vsel %vm1452_vm6, %v1447_v20, %v1450_v21  ;;  %2106 = vmatprep.subr.bf16.mxu1 %v2277_v28 }
 0xf0c   :  { %v1457_v22 = vsel %vm1456_vm7, %v1453_v62, 0.0 }
 0xf0d   :  { %1458 = vadd.xlane.f32.xlu0 %v1457_v22 }
 0xf0e   :  { %2108 = vmatpush3.bf16.msra.mxu1 %v2107_v30 }
 0xf0f   :  { %2109 = vmatprep.subr.bf16.mxu1 %v2277_v28 }
 0xf9a   :  { %v1459_v56 = vpop.xlane.xlu0 %1458 }
 0xf9b   :  { %v1460_v23 = vmul.f32 0.03125, %v1459_v56 }
 0xf9d   :  { %v1461_v24 = vsub.f32 %v1453_v62, %v1460_v23 }
 0xf9f   :  { %v1462_v25 = vmul.f32 %v1461_v24, %v1461_v24 }
 0xfa1   :  { %v1463_v26 = vsel %vm1456_vm7, %v1462_v25, 0.0 }
 0xfa2   :  { %1464 = vadd.xlane.f32.xlu1 %v1463_v26 }
0x102f   :  { %v1465_v36 = vpop.xlane.xlu1 %1464 }
0x1030   :  { %v1466_v37 = vmul.f32 0.03125, %v1465_v36 }
0x1032   :  { %v1467_v45 = vadd.f32 1e-05, %v1466_v37 }
0x1034   :  { %2235 = vrsqrt.f32 %v1467_v45 }
0x103e   :  { %v2236_v39 = vpop.eup %2235 }
0x103f   :  { %v1469_v41 = vmul.f32 %v2236_v39, %v1461_v24 }
0x1041   :  { %v1474_v44 = vmul.f32 %v1712_v40, %v1469_v41 }
0x1043   :  { %v1479_v48 = vadd.f32 %v1713_v43, %v1474_v44 }
0x1045   :  { %1954 = vmatmul.mubr.msk.f32.vlgmr.msra.gmra.mrb[12].mxu1 %vm156_vm0, %v1479_v48 }
0x1046   :  { %2111 = vmatpush3.bf16.msra.mxu1 %v2110_v46  ;;  %1988 = vmatprep.mubr.msk.f32.mxu1 %vm2278_vm8, %v2279_v47 }
0x1047   :  { %2112 = vmatprep.subr.bf16.mxu1 %v2277_v28 }
0x104a   :  { %2114 = vmatpush3.bf16.msra.mxu1 %v2113_v51 }
0x104b   :  { %2115 = vmatprep.subr.bf16.mxu1 %v2277_v28 }
0x104e   :  { %2117 = vmatpush3.bf16.msra.mxu1 %v2116_v54 }
0x104f   :  { %2118 = vmatprep.subr.bf16.mxu1 %v2277_v28 }
0x1052   :  { %2120 = vmatpush3.bf16.msra.mxu1 %v2119_v58 }
0x1053   :  { %2121 = vmatprep.subr.bf16.mxu1 %v2277_v28 }
0x1056   :  { %2123 = vmatpush3.bf16.msra.mxu1 %v2122_v61 }
0x1057   :  { %2124 = vmatprep.subr.bf16.mxu1 %v2277_v28 }
0x105a   :  { %2126 = vmatpush3.bf16.msra.mxu1 %v2125_v1 }
0x105b   :  { %2127 = vmatprep.subr.bf16.mxu1 %v2277_v28 }
0x105e   :  { %2129 = vmatpush3.bf16.msra.mxu1 %v2128_v4 }
0x105f   :  { %2130 = vmatprep.subr.bf16.mxu1 %v2277_v28 }
0x1062   :  { %2132 = vmatpush3.bf16.msra.mxu1 %v2131_v7 }
0x1118   :  { %v1558_v9 = vpop.f32.mrb[12].mxu1 }
0x1119   :  { %v1559_v10 = vadd.f32 %v1714_v8, %v1558_v9  ;;  %v1955_v32 = vpop.f32.mrb[13].mxu1 }
0x111b   :  { %v1563_v35 = vmul.f32 0.70710677, %v1559_v10  ;;  %v1562_v11 = vmul.f32 0.5, %v1559_v10 }
0x111d   :  { %2237 = verf.f32 %v1563_v35 }
0x1127   :  { %v2238_v33 = vpop.eup %2237 }
0x1128   :  { %v1565_v12 = vadd.f32 1.0, %v2238_v33 }
0x112a   :  { %v1566_v13 = vmul.f32 %v1565_v12, %v1562_v11 }
0x112c   :  { %1989 = vmatmul.mubr.f32.vlgmr.msra.gmra.mrb[14].mxu1 %v1566_v13 }
0x11ff   :  { %v1654_v16 = vpop.f32.mrb[14].mxu1 }
0x1200   :  { %v1655_v17 = vadd.f32 %v1716_v15, %v1654_v16  ;;  %v1990_v18 = vpop.f32.mrb[15].mxu1 }
0x1202   :  { %1658 = vst [vmem:[#allocation2] sm:$0x3] %v1655_v17 }
0x1203   :  { %2250 = shalt.err (!%p2247_p4)
}
0x1204   :  { %s2251_s30 = scalar_lea.hbm %s2782_s11, 32 }
0x1205   :  { %p2252_p5 = scmp.ne.s32.totalorder %s2782_s11, %s2251_s30  ;;  %p2255_p6 = scmp.lt.u32.totalorder %s2251_s30, %s2782_s11 }
0x1207   :  { %p2257_p7 = pnand %p2255_p6, %p2252_p5 }
0x1209   :  { %2260 = shalt.err (!%p2257_p7)
}
0x120a   :  { %1668 = dma.vmem_to_hbm [thread:$0]  %s1666_s6, 32, %s2782_s11, [#allocation3]  }
0x120b   :  { %2261 = dma.done.wait [#allocation3], 32  }
0x120c   :  { %2262 = vsyncadd [#allocation3], 4294967264 }
0x120d   :  { %1672 = vsyncpa [#allocation3], 1 }

</bundles_post_ra>
